<compile_context>
chip_gen: v6e
topology: v6e:2x2x1
jax: 0.10.0
libtpu: 0.0.40
codegen_flags: <defaults>
</compile_context>

<pallas_src>
import functools

import jax
import jax.numpy as jnp
from jax.experimental import pallas as pl
from jax.experimental.pallas import tpu as pltpu


def autopad(k, p=None):
    if p is None:
        p = k // 2 if isinstance(k, int) else [x // 2 for x in k]
    return p


def _conv_bn_act_kernel(k, s, h_out, w_out, apply_act,
                        x_ref, w_ref, scale_ref, bias_ref, o_ref):
    """One batch element: padded NHWC input tile -> conv + folded BN + Hardswish."""
    x = x_ref[0]                     # (Hp, Wp, C1)
    c1 = x.shape[-1]
    c2 = o_ref.shape[-1]

    acc = jnp.zeros((h_out * w_out, c2), jnp.float32)
    # Shift-and-matmul conv: for each kernel tap, a strided window of the input
    # hits the MXU against the (C1, C2) weight slice.  All taps accumulate in f32.
    for kh in range(k):
        for kw in range(k):
            if s == 1:
                patch = x[kh:kh + h_out, kw:kw + w_out, :]
            else:
                patch = jax.lax.slice(
                    x,
                    (kh, kw, 0),
                    (kh + (h_out - 1) * s + 1, kw + (w_out - 1) * s + 1, c1),
                    (s, s, 1))
            acc = acc + jnp.dot(patch.reshape(h_out * w_out, c1),
                                w_ref[kh, kw],
                                preferred_element_type=jnp.float32)

    # Fused inference BatchNorm (pre-folded to per-channel scale/bias) ...
    y = acc * scale_ref[...] + bias_ref[...]
    # ... and fused Hardswish: y * relu6(y + 3) / 6
    if apply_act:
        y = y * jnp.clip(y + 3.0, 0.0, 6.0) * (1.0 / 6.0)

    o_ref[0] = y.reshape(h_out, w_out, c2).astype(o_ref.dtype)


def conv_forward(x, weight, bn_gamma, bn_beta, bn_mean, bn_var,
                 *, k=1, s=1, p=None, g=1, act=True, eps=1e-5):
    """Pallas forward of Conv (Conv2d no-bias -> BatchNorm2d -> Hardswish).

    x:      (N, C1, H, W)  NCHW (PyTorch layout)
    weight: (C2, C1, k, k) OIHW (PyTorch layout)
    Returns (N, C2, H_out, W_out) NCHW.
    """
    if g != 1:
        # TODO(synk): grouped convolution (g > 1) is not implemented in the kernel.
        raise NotImplementedError("grouped conv (g > 1) not supported")

    p = autopad(k, p)
    n, c1, h, w = x.shape
    c2 = weight.shape[0]
    h_out = (h + 2 * p - k) // s + 1
    w_out = (w + 2 * p - k) // s + 1

    # Fold BatchNorm (inference / running stats) into per-channel scale & bias.
    scale = (bn_gamma * jax.lax.rsqrt(bn_var.astype(jnp.float32) + eps)).astype(jnp.float32)
    bias = (bn_beta - bn_mean * scale).astype(jnp.float32)
    scale = scale.reshape(1, c2)
    bias = bias.reshape(1, c2)

    # Layout plumbing: NCHW -> NHWC (lane-dense channels) + zero-pad; OIHW -> HWIO.
    x_nhwc = jnp.transpose(x, (0, 2, 3, 1))
    x_pad = jnp.pad(x_nhwc, ((0, 0), (p, p), (p, p), (0, 0)))
    hp, wp = h + 2 * p, w + 2 * p
    w_hwio = jnp.transpose(weight, (2, 3, 1, 0)).astype(jnp.float32)

    kernel = functools.partial(_conv_bn_act_kernel, k, s, h_out, w_out, bool(act))

    # TODO(synk): for very large H*W, additionally tile the output-row axis so a
    # single batch element's activations never exceed the v7x 32 MiB scoped VMEM.
    out_nhwc = pl.pallas_call(
        kernel,
        out_shape=jax.ShapeDtypeStruct((n, h_out, w_out, c2), x.dtype),
        grid_spec=pltpu.PrefetchScalarGridSpec(
            num_scalar_prefetch=0,
            grid=(n,),
            in_specs=[
                pl.BlockSpec((1, hp, wp, c1), lambda i: (i, 0, 0, 0)),
                pl.BlockSpec((k, k, c1, c2), lambda i: (0, 0, 0, 0)),
                pl.BlockSpec((1, c2), lambda i: (0, 0)),
                pl.BlockSpec((1, c2), lambda i: (0, 0)),
            ],
            out_specs=pl.BlockSpec((1, h_out, w_out, c2), lambda i: (i, 0, 0, 0)),
        ),
        compiler_params=pltpu.CompilerParams(dimension_semantics=("parallel",)),
    )(x_pad, w_hwio, scale, bias)

    return jnp.transpose(out_nhwc, (0, 3, 1, 2))  # back to NCHW


if __name__ == "__main__":
    key = jax.random.PRNGKey(0)
    kx, kw, kg, kb, km, kv = jax.random.split(key, 6)

    # Small shapes consistent with the module: batch=2, c1=4, c2=8, 16x16, 3x3/s1 conv.
    N, C1, H, W = 2, 4, 16, 16
    C2, K, S = 8, 3, 1

    x = jax.random.normal(kx, (N, C1, H, W), dtype=jnp.float32)
    weight = jax.random.normal(kw, (C2, C1, K, K), dtype=jnp.float32) * 0.1
    gamma = jax.random.uniform(kg, (C2,), minval=0.5, maxval=1.5, dtype=jnp.float32)
    beta = jax.random.normal(kb, (C2,), dtype=jnp.float32) * 0.1
    mean = jax.random.normal(km, (C2,), dtype=jnp.float32) * 0.1
    var = jax.random.uniform(kv, (C2,), minval=0.5, maxval=1.5, dtype=jnp.float32)

    out = conv_forward(x, weight, gamma, beta, mean, var, k=K, s=S, act=True)
    out = jax.block_until_ready(out)

    # Pure-JAX reference: conv -> BN (inference) -> hardswish.
    pad = autopad(K)
    ref = jax.lax.conv_general_dilated(
        x, weight, window_strides=(S, S), padding=[(pad, pad), (pad, pad)],
        dimension_numbers=("NCHW", "OIHW", "NCHW"))
    r_scale = gamma / jnp.sqrt(var + 1e-5)
    r_bias = beta - mean * r_scale
    ref = ref * r_scale[None, :, None, None] + r_bias[None, :, None, None]
    ref = ref * jnp.clip(ref + 3.0, 0.0, 6.0) / 6.0

    assert out.shape == (N, C2, H, W), out.shape
    max_err = float(jnp.max(jnp.abs(out - ref)))
    assert jnp.allclose(out, ref, atol=1e-4, rtol=1e-4), f"max abs err {max_err}"

    print("KERNEL_OK")
</pallas_src>

<mosaic_0001>
module attributes {stable_mosaic.version = 11 : i64} {
  func.func @_conv_bn_act_kernel(%arg0: i32, %arg1: memref<1x18x18x4xf32, #tpu.memory_space<vmem>>, %arg2: memref<3x3x4x8xf32, #tpu.memory_space<vmem>>, %arg3: memref<1x8xf32, #tpu.memory_space<vmem>>, %arg4: memref<1x8xf32, #tpu.memory_space<vmem>>, %arg5: memref<1x16x16x8xf32, #tpu.memory_space<vmem>>) attributes {dimension_semantics = [#tpu.dimension_semantics<parallel>], iteration_bounds = array<i64: 2>, scalar_prefetch = 0 : i64, scratch_operands = 0 : i64, tpu.core_type = #tpu.core_type<tc>, window_params = [{transform_indices = @transform_0, window_bounds = array<i64: 1, 18, 18, 4>}, {pipeline_mode = #tpu.pipeline_mode<synchronous>, transform_indices = @transform_1, window_bounds = array<i64: 3, 3, 4, 8>}, {pipeline_mode = #tpu.pipeline_mode<synchronous>, transform_indices = @transform_2, window_bounds = array<i64: 1, 8>}, {pipeline_mode = #tpu.pipeline_mode<synchronous>, transform_indices = @transform_3, window_bounds = array<i64: 1, 8>}, {transform_indices = @transform_4, window_bounds = array<i64: 1, 16, 16, 8>}]} {
    %c0 = arith.constant 0 : index
    %c0_0 = arith.constant 0 : index
    %c0_1 = arith.constant 0 : index
    %c0_2 = arith.constant 0 : index
    %0 = vector.load %arg1[%c0, %c0_0, %c0_1, %c0_2] : memref<1x18x18x4xf32, #tpu.memory_space<vmem>>, vector<1x18x18x4xf32>
    %1 = vector.shape_cast %0 : vector<1x18x18x4xf32> to vector<18x18x4xf32>
    %cst = arith.constant 0.000000e+00 : f32
    %2 = vector.broadcast %cst : f32 to vector<256x8xf32>
    %3 = vector.extract_strided_slice %1 {offsets = [0, 0, 0], sizes = [16, 16, 4], strides = [1, 1, 1]} : vector<18x18x4xf32> to vector<16x16x4xf32>
    %4 = vector.shape_cast %3 : vector<16x16x4xf32> to vector<256x4xf32>
    %c0_3 = arith.constant 0 : index
    %c0_4 = arith.constant 0 : index
    %c0_5 = arith.constant 0 : index
    %c0_6 = arith.constant 0 : index
    %5 = vector.load %arg2[%c0_3, %c0_4, %c0_5, %c0_6] : memref<3x3x4x8xf32, #tpu.memory_space<vmem>>, vector<1x1x4x8xf32>
    %6 = vector.shape_cast %5 : vector<1x1x4x8xf32> to vector<4x8xf32>
    %cst_7 = arith.constant dense<0.000000e+00> : vector<256x8xf32>
    %7 = tpu.matmul %4, %6, %cst_7 {dimension_numbers = #tpu.dot_dimension_numbers<[1], [0], [0], [1], [0, 0, 1, 1], [], []>} : vector<256x4xf32>, vector<4x8xf32>, vector<256x8xf32> -> vector<256x8xf32>
    %8 = arith.addf %2, %7 : vector<256x8xf32>
    %9 = vector.extract_strided_slice %1 {offsets = [0, 1, 0], sizes = [16, 16, 4], strides = [1, 1, 1]} : vector<18x18x4xf32> to vector<16x16x4xf32>
    %10 = vector.shape_cast %9 : vector<16x16x4xf32> to vector<256x4xf32>
    %c0_8 = arith.constant 0 : index
    %c1 = arith.constant 1 : index
    %c0_9 = arith.constant 0 : index
    %c0_10 = arith.constant 0 : index
    %11 = vector.load %arg2[%c0_8, %c1, %c0_9, %c0_10] : memref<3x3x4x8xf32, #tpu.memory_space<vmem>>, vector<1x1x4x8xf32>
    %12 = vector.shape_cast %11 : vector<1x1x4x8xf32> to vector<4x8xf32>
    %cst_11 = arith.constant dense<0.000000e+00> : vector<256x8xf32>
    %13 = tpu.matmul %10, %12, %cst_11 {dimension_numbers = #tpu.dot_dimension_numbers<[1], [0], [0], [1], [0, 0, 1, 1], [], []>} : vector<256x4xf32>, vector<4x8xf32>, vector<256x8xf32> -> vector<256x8xf32>
    %14 = arith.addf %8, %13 : vector<256x8xf32>
    %15 = vector.extract_strided_slice %1 {offsets = [0, 2, 0], sizes = [16, 16, 4], strides = [1, 1, 1]} : vector<18x18x4xf32> to vector<16x16x4xf32>
    %16 = vector.shape_cast %15 : vector<16x16x4xf32> to vector<256x4xf32>
    %c0_12 = arith.constant 0 : index
    %c2 = arith.constant 2 : index
    %c0_13 = arith.constant 0 : index
    %c0_14 = arith.constant 0 : index
    %17 = vector.load %arg2[%c0_12, %c2, %c0_13, %c0_14] : memref<3x3x4x8xf32, #tpu.memory_space<vmem>>, vector<1x1x4x8xf32>
    %18 = vector.shape_cast %17 : vector<1x1x4x8xf32> to vector<4x8xf32>
    %cst_15 = arith.constant dense<0.000000e+00> : vector<256x8xf32>
    %19 = tpu.matmul %16, %18, %cst_15 {dimension_numbers = #tpu.dot_dimension_numbers<[1], [0], [0], [1], [0, 0, 1, 1], [], []>} : vector<256x4xf32>, vector<4x8xf32>, vector<256x8xf32> -> vector<256x8xf32>
    %20 = arith.addf %14, %19 : vector<256x8xf32>
    %21 = vector.extract_strided_slice %1 {offsets = [1, 0, 0], sizes = [16, 16, 4], strides = [1, 1, 1]} : vector<18x18x4xf32> to vector<16x16x4xf32>
    %22 = vector.shape_cast %21 : vector<16x16x4xf32> to vector<256x4xf32>
    %c1_16 = arith.constant 1 : index
    %c0_17 = arith.constant 0 : index
    %c0_18 = arith.constant 0 : index
    %c0_19 = arith.constant 0 : index
    %23 = vector.load %arg2[%c1_16, %c0_17, %c0_18, %c0_19] : memref<3x3x4x8xf32, #tpu.memory_space<vmem>>, vector<1x1x4x8xf32>
    %24 = vector.shape_cast %23 : vector<1x1x4x8xf32> to vector<4x8xf32>
    %cst_20 = arith.constant dense<0.000000e+00> : vector<256x8xf32>
    %25 = tpu.matmul %22, %24, %cst_20 {dimension_numbers = #tpu.dot_dimension_numbers<[1], [0], [0], [1], [0, 0, 1, 1], [], []>} : vector<256x4xf32>, vector<4x8xf32>, vector<256x8xf32> -> vector<256x8xf32>
    %26 = arith.addf %20, %25 : vector<256x8xf32>
    %27 = vector.extract_strided_slice %1 {offsets = [1, 1, 0], sizes = [16, 16, 4], strides = [1, 1, 1]} : vector<18x18x4xf32> to vector<16x16x4xf32>
    %28 = vector.shape_cast %27 : vector<16x16x4xf32> to vector<256x4xf32>
    %c1_21 = arith.constant 1 : index
    %c1_22 = arith.constant 1 : index
    %c0_23 = arith.constant 0 : index
    %c0_24 = arith.constant 0 : index
    %29 = vector.load %arg2[%c1_21, %c1_22, %c0_23, %c0_24] : memref<3x3x4x8xf32, #tpu.memory_space<vmem>>, vector<1x1x4x8xf32>
    %30 = vector.shape_cast %29 : vector<1x1x4x8xf32> to vector<4x8xf32>
    %cst_25 = arith.constant dense<0.000000e+00> : vector<256x8xf32>
    %31 = tpu.matmul %28, %30, %cst_25 {dimension_numbers = #tpu.dot_dimension_numbers<[1], [0], [0], [1], [0, 0, 1, 1], [], []>} : vector<256x4xf32>, vector<4x8xf32>, vector<256x8xf32> -> vector<256x8xf32>
    %32 = arith.addf %26, %31 : vector<256x8xf32>
    %33 = vector.extract_strided_slice %1 {offsets = [1, 2, 0], sizes = [16, 16, 4], strides = [1, 1, 1]} : vector<18x18x4xf32> to vector<16x16x4xf32>
    %34 = vector.shape_cast %33 : vector<16x16x4xf32> to vector<256x4xf32>
    %c1_26 = arith.constant 1 : index
    %c2_27 = arith.constant 2 : index
    %c0_28 = arith.constant 0 : index
    %c0_29 = arith.constant 0 : index
    %35 = vector.load %arg2[%c1_26, %c2_27, %c0_28, %c0_29] : memref<3x3x4x8xf32, #tpu.memory_space<vmem>>, vector<1x1x4x8xf32>
    %36 = vector.shape_cast %35 : vector<1x1x4x8xf32> to vector<4x8xf32>
    %cst_30 = arith.constant dense<0.000000e+00> : vector<256x8xf32>
    %37 = tpu.matmul %34, %36, %cst_30 {dimension_numbers = #tpu.dot_dimension_numbers<[1], [0], [0], [1], [0, 0, 1, 1], [], []>} : vector<256x4xf32>, vector<4x8xf32>, vector<256x8xf32> -> vector<256x8xf32>
    %38 = arith.addf %32, %37 : vector<256x8xf32>
    %39 = vector.extract_strided_slice %1 {offsets = [2, 0, 0], sizes = [16, 16, 4], strides = [1, 1, 1]} : vector<18x18x4xf32> to vector<16x16x4xf32>
    %40 = vector.shape_cast %39 : vector<16x16x4xf32> to vector<256x4xf32>
    %c2_31 = arith.constant 2 : index
    %c0_32 = arith.constant 0 : index
    %c0_33 = arith.constant 0 : index
    %c0_34 = arith.constant 0 : index
    %41 = vector.load %arg2[%c2_31, %c0_32, %c0_33, %c0_34] : memref<3x3x4x8xf32, #tpu.memory_space<vmem>>, vector<1x1x4x8xf32>
    %42 = vector.shape_cast %41 : vector<1x1x4x8xf32> to vector<4x8xf32>
    %cst_35 = arith.constant dense<0.000000e+00> : vector<256x8xf32>
    %43 = tpu.matmul %40, %42, %cst_35 {dimension_numbers = #tpu.dot_dimension_numbers<[1], [0], [0], [1], [0, 0, 1, 1], [], []>} : vector<256x4xf32>, vector<4x8xf32>, vector<256x8xf32> -> vector<256x8xf32>
    %44 = arith.addf %38, %43 : vector<256x8xf32>
    %45 = vector.extract_strided_slice %1 {offsets = [2, 1, 0], sizes = [16, 16, 4], strides = [1, 1, 1]} : vector<18x18x4xf32> to vector<16x16x4xf32>
    %46 = vector.shape_cast %45 : vector<16x16x4xf32> to vector<256x4xf32>
    %c2_36 = arith.constant 2 : index
    %c1_37 = arith.constant 1 : index
    %c0_38 = arith.constant 0 : index
    %c0_39 = arith.constant 0 : index
    %47 = vector.load %arg2[%c2_36, %c1_37, %c0_38, %c0_39] : memref<3x3x4x8xf32, #tpu.memory_space<vmem>>, vector<1x1x4x8xf32>
    %48 = vector.shape_cast %47 : vector<1x1x4x8xf32> to vector<4x8xf32>
    %cst_40 = arith.constant dense<0.000000e+00> : vector<256x8xf32>
    %49 = tpu.matmul %46, %48, %cst_40 {dimension_numbers = #tpu.dot_dimension_numbers<[1], [0], [0], [1], [0, 0, 1, 1], [], []>} : vector<256x4xf32>, vector<4x8xf32>, vector<256x8xf32> -> vector<256x8xf32>
    %50 = arith.addf %44, %49 : vector<256x8xf32>
    %51 = vector.extract_strided_slice %1 {offsets = [2, 2, 0], sizes = [16, 16, 4], strides = [1, 1, 1]} : vector<18x18x4xf32> to vector<16x16x4xf32>
    %52 = vector.shape_cast %51 : vector<16x16x4xf32> to vector<256x4xf32>
    %c2_41 = arith.constant 2 : index
    %c2_42 = arith.constant 2 : index
    %c0_43 = arith.constant 0 : index
    %c0_44 = arith.constant 0 : index
    %53 = vector.load %arg2[%c2_41, %c2_42, %c0_43, %c0_44] : memref<3x3x4x8xf32, #tpu.memory_space<vmem>>, vector<1x1x4x8xf32>
    %54 = vector.shape_cast %53 : vector<1x1x4x8xf32> to vector<4x8xf32>
    %cst_45 = arith.constant dense<0.000000e+00> : vector<256x8xf32>
    %55 = tpu.matmul %52, %54, %cst_45 {dimension_numbers = #tpu.dot_dimension_numbers<[1], [0], [0], [1], [0, 0, 1, 1], [], []>} : vector<256x4xf32>, vector<4x8xf32>, vector<256x8xf32> -> vector<256x8xf32>
    %56 = arith.addf %50, %55 : vector<256x8xf32>
    %c0_46 = arith.constant 0 : index
    %c0_47 = arith.constant 0 : index
    %57 = vector.load %arg3[%c0_46, %c0_47] : memref<1x8xf32, #tpu.memory_space<vmem>>, vector<1x8xf32>
    %58 = vector.broadcast %57 : vector<1x8xf32> to vector<256x8xf32>
    %59 = arith.mulf %56, %58 : vector<256x8xf32>
    %c0_48 = arith.constant 0 : index
    %c0_49 = arith.constant 0 : index
    %60 = vector.load %arg4[%c0_48, %c0_49] : memref<1x8xf32, #tpu.memory_space<vmem>>, vector<1x8xf32>
    %61 = vector.broadcast %60 : vector<1x8xf32> to vector<256x8xf32>
    %62 = arith.addf %59, %61 : vector<256x8xf32>
    %cst_50 = arith.constant 3.000000e+00 : f32
    %63 = vector.broadcast %cst_50 : f32 to vector<256x8xf32>
    %64 = arith.addf %62, %63 : vector<256x8xf32>
    %cst_51 = arith.constant 0.000000e+00 : f32
    %cst_52 = arith.constant 6.000000e+00 : f32
    %65 = vector.broadcast %cst_51 : f32 to vector<256x8xf32>
    %66 = arith.maximumf %65, %64 : vector<256x8xf32>
    %67 = vector.broadcast %cst_52 : f32 to vector<256x8xf32>
    %68 = arith.minimumf %67, %66 : vector<256x8xf32>
    %69 = arith.mulf %62, %68 : vector<256x8xf32>
    %cst_53 = arith.constant 0.166666672 : f32
    %70 = vector.broadcast %cst_53 : f32 to vector<256x8xf32>
    %71 = arith.mulf %69, %70 : vector<256x8xf32>
    %72 = vector.shape_cast %71 : vector<256x8xf32> to vector<16x16x8xf32>
    %c0_54 = arith.constant 0 : index
    %c0_55 = arith.constant 0 : index
    %c0_56 = arith.constant 0 : index
    %c0_57 = arith.constant 0 : index
    %73 = vector.load %arg5[%c0_54, %c0_55, %c0_56, %c0_57] : memref<1x16x16x8xf32, #tpu.memory_space<vmem>>, vector<1x16x16x8xf32>
    %74 = vector.shape_cast %73 : vector<1x16x16x8xf32> to vector<16x16x8xf32>
    %75 = vector.shape_cast %72 : vector<16x16x8xf32> to vector<1x16x16x8xf32>
    tpu.vector_store %arg5[%c0_54, %c0_55, %c0_56, %c0_57], %75 {strides = array<i32>} : memref<1x16x16x8xf32, #tpu.memory_space<vmem>>, vector<1x16x16x8xf32>,
    return
  }
  func.func @transform_0(%arg0: i32) -> (i32, i32, i32, i32) {
    %c0_i32 = arith.constant 0 : i32
    %c0_i32_0 = arith.constant 0 : i32
    %c0_i32_1 = arith.constant 0 : i32
    %c0_i32_2 = arith.constant 0 : i32
    return %arg0, %c0_i32, %c0_i32_0, %c0_i32_1 : i32, i32, i32, i32
  }
  func.func @transform_1(%arg0: i32) -> (i32, i32, i32, i32) {
    %c0_i32 = arith.constant 0 : i32
    %c0_i32_0 = arith.constant 0 : i32
    %c0_i32_1 = arith.constant 0 : i32
    %c0_i32_2 = arith.constant 0 : i32
    %c0_i32_3 = arith.constant 0 : i32
    return %c0_i32, %c0_i32_0, %c0_i32_1, %c0_i32_2 : i32, i32, i32, i32
  }
  func.func @transform_2(%arg0: i32) -> (i32, i32) {
    %c0_i32 = arith.constant 0 : i32
    %c0_i32_0 = arith.constant 0 : i32
    %c0_i32_1 = arith.constant 0 : i32
    return %c0_i32, %c0_i32_0 : i32, i32
  }
  func.func @transform_3(%arg0: i32) -> (i32, i32) {
    %c0_i32 = arith.constant 0 : i32
    %c0_i32_0 = arith.constant 0 : i32
    %c0_i32_1 = arith.constant 0 : i32
    return %c0_i32, %c0_i32_0 : i32, i32
  }
  func.func @transform_4(%arg0: i32) -> (i32, i32, i32, i32) {
    %c0_i32 = arith.constant 0 : i32
    %c0_i32_0 = arith.constant 0 : i32
    %c0_i32_1 = arith.constant 0 : i32
    %c0_i32_2 = arith.constant 0 : i32
    return %arg0, %c0_i32, %c0_i32_0, %c0_i32_1 : i32, i32, i32, i32
  }
}

</mosaic_0001>

<bundles_post_ra>
// kernel: tpu_custom_call.1
= control target key start
LH: loop header
LB: loop body
LE: loop exit
PB: predicated region body
PF: predicated region fallthrough
CT: control target
= control target key end

     0   :  { %s4434_s15 = smov 0   ;;  %s6158_s0 = inlined_call_operand.vmem [shape: f32[2,18,18,4], index: 0, kind: input, shape index: {}]   ;;  %s6159_s1 = inlined_call_operand.vmem [shape: f32[3,3,4,8], index: 1, kind: input, shape index: {}]   ;;  %s6160_s2 = inlined_call_operand.vmem [shape: f32[1,8], index: 2, kind: input, shape index: {}]   ;;  %s6161_s3 = inlined_call_operand.vmem [shape: f32[1,8], index: 3, kind: input, shape index: {}]   ;;  %s6162_s4 = inlined_call_operand.vmem [shape: f32[2,16,16,8], index: 4, kind: output, shape index: {}]  }
   0x1 LB: > { %s3325_s16 = sadd.s32 4294967295, %s4407_s15   ;;  %p3329_p0 = scmp.ge.s32.totalorder %s4407_s15, 1  ;;  %s4407_s15 = sphi %s4434_s15, %s14_s15  }
   0x2   : > { %p162_p1 = scmp.lt.s32.totalorder %s4407_s15, 3 }
   0x4   : > { %p163_p2 = pnand %p3329_p0, %p162_p1 }
   0x6   : > { %166 = sbr.rel (%p163_p2) target bundleno = 528 (0x210), region = 36 }
   0xb   : > { %v3333_v0 = vld [vmem:[%s6159_s1 + $0x4] sm:$0xf]  ;;  %vm449_vm0 = vcmask 1043456   ;;  %p188_p3 = scmp.lt.s32.totalorder %s3325_s16, 1  ;;  %v252_v1 = vld [vmem:[%s6159_s1] sm:$0xf] }
   0xc   : > { %4390 = vmatprep.subr.msk.mxu1 %vm449_vm0, %v3333_v0  ;;  %3940 = vmatprep.subr.msk.mxu0 %vm449_vm0, %v3333_v0  ;;  %v3400_v2 = vld [vmem:[%s6159_s1 + $0x8] sm:$0xf]  ;;  %vm301_vm1 = vcmask 1046528   ;;  %vm384_vm2 = vcmask 31744   ;;  %v4506_v21 = vld [vmem:[%s6159_s1 + $0xc] sm:$0xf] }
   0xd   : > { %4391 = vmatpush3.msk.msra.mxu1 %vm449_vm0, %v3333_v0  ;;  %3941 = vmatpush3.msk.msra.mxu0 %vm449_vm0, %v3333_v0  ;;  %s6406_s16 = smov (!%p188_p3, %s3325_s16), 1  ;;  %v4524_v28 = vld [vmem:[%s6159_s1 + $0x10] sm:$0xf]  ;;  %vm970_vm3 = vcmask 1045504   ;;  %vm3237_vm4 = vcmask 64512  }
   0xe   : > { %3990 = vmatprep.subr.msk.mxu1 %vm449_vm0, %v252_v1  ;;  %4040 = vmatprep.subr.msk.mxu0 %vm449_vm0, %v3400_v2  ;;  %s4392_s23 = smul.u32 432, %s6406_s16  ;;  %s3642_s19 = sshll.u32 %s6406_s16, 8 }
   0xf   : > { %s6010_s21 = scalar_lea.vmem %s6162_s4, %s3642_s19 }
  0x10   : > { %s4463_s26 = scalar_lea.vmem %s6158_s0, %s4392_s23 }
  0x11   : > { %v4466_v3 = vld [vmem:[%s4463_s26] sm:$0xff]  ;;  %v4469_v4 = vld [vmem:[%s4463_s26 + $0x8] sm:$0xff]  ;;  %v4481_v10 = vld [vmem:[%s4463_s26 + $0x10] sm:$0x3] }
  0x12   : > { %v4472_v5 = vld [vmem:[%s4463_s26 + $0xc0] sm:$0xff]  ;;  %v302_v6 = vrot.slane %v4466_v3, 1  ;;  %v303_v7 = vrot.slane %v4469_v4, 1  ;;  %v4477_v8 = vld [vmem:[%s4463_s26 + $0xc8] sm:$0xff]  ;;  %v305_v12 = vrot.slane %v4481_v10, 1  ;;  %v4489_v14 = vld [vmem:[%s4463_s26 + $0x18] sm:$0xff] }
  0x13   : > { %v342_v9 = vrot.slane %v4472_v5, 1  ;;  %v343_v11 = vrot.slane %v4477_v8, 1  ;;  %v4486_v13 = vld [vmem:[%s4463_s26 + $0xd0] sm:$0x3]  ;;  %v4494_v17 = vld [vmem:[%s4463_s26 + $0x20] sm:$0xff]  ;;  %v307_v18 = vrot.slane %v4489_v14, 1 }
  0x14   : > { %v304_v15 = vsel %vm301_vm1, %v302_v6, %v303_v7  ;;  %v345_v16 = vrot.slane %v4486_v13, 1  ;;  %v4498_v19 = vld [vmem:[%s4463_s26 + $0xd8] sm:$0xff]  ;;  %v4501_v20 = vld [vmem:[%s4463_s26 + $0xe0] sm:$0xff]  ;;  %v306_v23 = vsel %vm301_vm1, %v303_v7, %v305_v12  ;;  %v308_v24 = vrot.slane %v4494_v17, 1  ;;  %v4516_v26 = vld [vmem:[%s4463_s26 + $0x28] sm:$0x3] }
  0x15   : > { %3942 = vmatprep.mubr.msk.f32.mxu0 %vm384_vm2, %v304_v15  ;;  %v4510_v22 = vsel %vm301_vm1, %v342_v9, %v343_v11  ;;  %v347_v25 = vrot.slane %v4498_v19, 1  ;;  %v4519_v27 = vld [vmem:[%s4463_s26 + $0xe8] sm:$0x3]  ;;  %v348_v30 = vrot.slane %v4501_v20, 1  ;;  %v310_v31 = vrot.slane %v4516_v26, 1  ;;  %v4536_v33 = vld [vmem:[%s4463_s26 + $0x30] sm:$0xff] }
  0x16   : > { %6245 = vst [vmem:[#allocation2_spill] sm:$0xff] %v4510_v22  ;;  %3966 = vmatprep.mubr.msk.f32.mxu1 %vm384_vm2, %v4510_v22  ;;  %3943 = vmatmul.mubr.msk.f32.vlgmr.msra.gmra.mxu0 %vm384_vm2, %v306_v23  ;;  %v4530_v29 = vsel %vm301_vm1, %v343_v11, %v345_v16  ;;  %v350_v32 = vrot.slane %v4519_v27, 1  ;;  %v4539_v34 = vld [vmem:[%s4463_s26 + $0x38] sm:$0xff]  ;;  %v4542_v35 = vld [vmem:[%s4463_s26 + $0xf0] sm:$0xff]  ;;  %v4548_v36 = vsel %vm301_vm1, %v307_v18, %v308_v24  ;;  %v312_v37 = vrot.slane %v4536_v33, 1  ;;  %v4576_v47 = vld [vmem:[%s4463_s26 + $0x48] sm:$0xff] }
  0x17   : > { %6246 = vst [vmem:[#allocation3_spill] sm:$0xff] %v4530_v29  ;;  %3967 = vmatmul.mubr.msk.f32.vlgmr.msra.gmra.mxu1 %vm384_vm2, %v4530_v29  ;;  %4041 = vmatpush3.msk.msra.mxu0 %vm449_vm0, %v3400_v2  ;;  %6247 = vst [vmem:[#allocation4_spill] sm:$0xff] %v4548_v36  ;;  %v313_v38 = vrot.slane %v4539_v34, 1  ;;  %v4553_v39 = vld [vmem:[%s4463_s26 + $0xf8] sm:$0xff]  ;;  %v352_v40 = vrot.slane %v4542_v35, 1  ;;  %v4563_v42 = vsel %vm301_vm1, %v347_v25, %v348_v30  ;;  %v4579_v48 = vld [vmem:[%s4463_s26 + $0x50] sm:$0xff] }
  0x18   : > { %v4557_v41 = vld [vmem:[%s4463_s26 + $0x40] sm:$0x3]  ;;  %3991 = vmatpush3.msk.msra.mxu1 %vm449_vm0, %v252_v1  ;;  %3945 = vmatprep.mubr.msk.f32.mxu0 %vm384_vm2, %v4548_v36  ;;  %6248 = vst [vmem:[#allocation5_spill] sm:$0xff] %v4563_v42  ;;  %v4566_v43 = vsel %vm301_vm1, %v308_v24, %v310_v31  ;;  %v4569_v44 = vsel %vm301_vm1, %v348_v30, %v350_v32  ;;  %v353_v45 = vrot.slane %v4553_v39, 1  ;;  %v317_v52 = vrot.slane %v4576_v47, 1  ;;  %v4590_v53 = vld [vmem:[%s4463_s26 + $0x108] sm:$0xff] }
  0x19   : > { %6249 = vst [vmem:[#allocation6_spill] sm:$0xff] %v4566_v43  ;;  %6250 = vst [vmem:[#allocation7_spill] sm:$0xff] %v4569_v44  ;;  %v4573_v46 = vld [vmem:[%s4463_s26 + $0x100] sm:$0x3]  ;;  %3969 = vmatprep.mubr.msk.f32.mxu1 %vm384_vm2, %v4563_v42  ;;  %v4584_v49 = vsel %vm301_vm1, %v312_v37, %v313_v38  ;;  %v315_v50 = vrot.slane %v4557_v41, 1  ;;  %v4593_v54 = vld [vmem:[%s4463_s26 + $0x110] sm:$0xff]  ;;  %4090 = vmatprep.subr.msk.mxu1 %vm449_vm0, %v4506_v21 }
  0x1a   : > { %6251 = vst [vmem:[#allocation8_spill] sm:$0xff] %v4584_v49  ;;  %v355_v51 = vrot.slane %v4573_v46, 1  ;;  %v4596_v55 = vld [vmem:[%s4463_s26 + $0x60] sm:$0xff]  ;;  %3946 = vmatmul.mubr.msk.f32.gmra.mxu0 %vm384_vm2, %v4566_v43  ;;  %v4603_v56 = vsel %vm301_vm1, %v352_v40, %v353_v45  ;;  %v318_v57 = vrot.slane %v4579_v48, 1  ;;  %v357_v58 = vrot.slane %v4590_v53, 1  ;;  %v4612_v61 = vld [vmem:[%s4463_s26 + $0x68] sm:$0xff]  ;;  %4140 = vmatprep.subr.msk.mxu0 %vm449_vm0, %v4524_v28 }
  0x1b   : > { %6252 = vst [vmem:[#allocation9_spill] sm:$0xff] %v4603_v56  ;;  %v358_v59 = vrot.slane %v4593_v54, 1  ;;  %v4609_v60 = vld [vmem:[%s4463_s26 + $0x58] sm:$0x3]  ;;  %3970 = vmatmul.mubr.msk.f32.gmra.mxu1 %vm384_vm2, %v4569_v44  ;;  %3948 = vmatprep.mubr.msk.f32.mxu0 %vm384_vm2, %v4584_v49  ;;  %v4621_v62 = vsel %vm301_vm1, %v313_v38, %v315_v50  ;;  %v322_v1 = vrot.slane %v4596_v55, 1  ;;  %v4629_v2 = vld [vmem:[%s4463_s26 + $0x120] sm:$0xff] }
  0x1c   : > { %6253 = vst [vmem:[#allocation10_spill] sm:$0xff] %v4621_v62  ;;  %v320_v63 = vrot.slane %v4609_v60, 1  ;;  %v4625_v0 = vld [vmem:[%s4463_s26 + $0x118] sm:$0x3]  ;;  %v4632_v6 = vld [vmem:[%s4463_s26 + $0x128] sm:$0xff]  ;;  %3972 = vmatprep.mubr.msk.f32.mxu1 %vm384_vm2, %v4603_v56  ;;  %v4637_v7 = vsel %vm301_vm1, %v353_v45, %v355_v51  ;;  %v4640_v9 = vsel %vm301_vm1, %v317_v52, %v318_v57  ;;  %v323_v12 = vrot.slane %v4612_v61, 1 }
  0x1d   : > { %6254 = vst [vmem:[#allocation11_spill] sm:$0xff] %v4637_v7  ;;  %6255 = vst [vmem:[#allocation12_spill] sm:$0xff] %v4640_v9  ;;  %v360_v11 = vrot.slane %v4625_v0, 1  ;;  %v4645_v15 = vld [vmem:[%s4463_s26 + $0x70] sm:$0x3]  ;;  %v4651_v18 = vsel %vm301_vm1, %v357_v58, %v358_v59  ;;  %v362_v23 = vrot.slane %v4629_v2, 1 }
  0x1e   : > { %v4648_v16 = vld [vmem:[%s4463_s26 + $0x130] sm:$0x3]  ;;  %6256 = vst [vmem:[#allocation13_spill] sm:$0xff] %v4651_v18  ;;  %v363_v24 = vrot.slane %v4632_v6, 1  ;;  %v4656_v25 = vld [vmem:[%s4463_s26 + $0x78] sm:$0xff]  ;;  %v4659_v30 = vld [vmem:[%s4463_s26 + $0x80] sm:$0xff]  ;;  %3949 = vmatmul.mubr.msk.f32.gmra.mxu0 %vm384_vm2, %v4621_v62  ;;  %v4674_v37 = vsel %vm301_vm1, %v318_v57, %v320_v63  ;;  %v4684_v50 = vsel %vm301_vm1, %v322_v1, %v323_v12 }
  0x1f   : > { %v4664_v31 = vld [vmem:[%s4463_s26 + $0x138] sm:$0xff]  ;;  %v4667_v32 = vld [vmem:[%s4463_s26 + $0x140] sm:$0xff]  ;;  %3973 = vmatmul.mubr.msk.f32.gmra.mxu1 %vm384_vm2, %v4637_v7  ;;  %3951 = vmatprep.mubr.msk.f32.mxu0 %vm384_vm2, %v4640_v9  ;;  %6257 = vst [vmem:[#allocation14_spill] sm:$0xff] %v4674_v37  ;;  %v325_v38 = vrot.slane %v4645_v15, 1  ;;  %v365_v40 = vrot.slane %v4648_v16, 1  ;;  %v4681_v45 = vsel %vm301_vm1, %v358_v59, %v360_v11  ;;  %6259 = vst [vmem:[#allocation16_spill] sm:$0xff] %v4684_v50 }
  0x20   : > { %3975 = vmatprep.mubr.msk.f32.mxu1 %vm384_vm2, %v4651_v18  ;;  %6258 = vst [vmem:[#allocation15_spill] sm:$0xff] %v4681_v45  ;;  %v327_v51 = vrot.slane %v4656_v25, 1  ;;  %v328_v52 = vrot.slane %v4659_v30, 1  ;;  %v4689_v57 = vld [vmem:[%s4463_s26 + $0x88] sm:$0x3]  ;;  %v4695_v63 = vsel %vm301_vm1, %v362_v23, %v363_v24  ;;  %v367_v7 = vrot.slane %v4664_v31, 1 }
  0x21   : > { %v4692_v58 = vld [vmem:[%s4463_s26 + $0x148] sm:$0x3]  ;;  %6260 = vst [vmem:[#allocation17_spill] sm:$0xff] %v4695_v63  ;;  %v368_v18 = vrot.slane %v4667_v32, 1  ;;  %v4700_v59 = vld [vmem:[%s4463_s26 + $0x90] sm:$0xff]  ;;  %v4703_v1 = vld [vmem:[%s4463_s26 + $0x98] sm:$0xff]  ;;  %v4718_v23 = vsel %vm301_vm1, %v323_v12, %v325_v38  ;;  %v4725_v29 = vsel %vm301_vm1, %v363_v24, %v365_v40 }
  0x22   : > { %3952 = vmatmul.mubr.msk.f32.gmra.mxu0 %vm384_vm2, %v4674_v37  ;;  %v4708_v11 = vld [vmem:[%s4463_s26 + $0x150] sm:$0xff]  ;;  %v4711_v56 = vld [vmem:[%s4463_s26 + $0x158] sm:$0xff]  ;;  %6262 = vst [vmem:[#allocation19_spill] sm:$0xff] %v4718_v23  ;;  %v330_v44 = vrot.slane %v4689_v57, 1  ;;  %v370_v42 = vrot.slane %v4692_v58, 1  ;;  %6263 = vst [vmem:[#allocation20_spill] sm:$0xff] %v4725_v29 }
  0x23   : > { %6261 = vst [vmem:[#allocation18_spill] sm:$0xff] %v4711_v56  ;;  %3976 = vmatmul.mubr.msk.f32.gmra.mxu1 %vm384_vm2, %v4681_v45  ;;  %3954 = vmatprep.mubr.msk.f32.mxu0 %vm384_vm2, %v4684_v50  ;;  %v4728_v45 = vsel %vm301_vm1, %v327_v51, %v328_v52  ;;  %v332_v22 = vrot.slane %v4700_v59, 1  ;;  %v333_v12 = vrot.slane %v4703_v1, 1  ;;  %v4733_v38 = vld [vmem:[%s4463_s26 + $0xa0] sm:$0x3]  ;;  %v4736_v50 = vsel %vm301_vm1, %v367_v7, %v368_v18  ;;  %v4744_v24 = vld [vmem:[%s4463_s26 + $0xa8] sm:$0xff] }
  0x24   : > { %3978 = vmatprep.mubr.msk.f32.mxu1 %vm384_vm2, %v4695_v63  ;;  %6264 = vst [vmem:[#allocation21_spill] sm:$0xff] %v4728_v45  ;;  %6265 = vst [vmem:[#allocation22_spill] sm:$0xff] %v4736_v50  ;;  %v372_v37 = vrot.slane %v4708_v11, 1  ;;  %v373_v9 = vrot.slane %v4711_v56, 1  ;;  %v4741_v63 = vld [vmem:[%s4463_s26 + $0x160] sm:$0x3]  ;;  %v4762_v7 = vsel %vm301_vm1, %v328_v52, %v330_v44  ;;  %v4765_v49 = vsel %vm301_vm1, %v368_v18, %v370_v42 }
  0x25   : > { %v4747_v40 = vld [vmem:[%s4463_s26 + $0xb0] sm:$0xff]  ;;  %v4752_v51 = vld [vmem:[%s4463_s26 + $0x168] sm:$0xff]  ;;  %6267 = vst [vmem:[#allocation24_spill] sm:$0xff] %v4762_v7  ;;  %6268 = vst [vmem:[#allocation25_spill] sm:$0xff] %v4765_v49  ;;  %v335_v43 = vrot.slane %v4733_v38, 1  ;;  %v375_v36 = vrot.slane %v4741_v63, 1 }
  0x26   : > { %3955 = vmatmul.mubr.msk.f32.gmra.mxu0 %vm384_vm2, %v4718_v23  ;;  %v4755_v62 = vld [vmem:[%s4463_s26 + $0x170] sm:$0xff]  ;;  %v4771_v23 = vsel %vm301_vm1, %v332_v22, %v333_v12  ;;  %v4777_v56 = vld [vmem:[%s4463_s26 + $0xb8] sm:$0x3]  ;;  %v4780_v44 = vsel %vm301_vm1, %v372_v37, %v373_v9  ;;  %v377_v42 = vrot.slane %v4752_v51, 1 }
  0x27   : > { %6266 = vst [vmem:[#allocation23_spill] sm:$0xff] %v4755_v62  ;;  %3979 = vmatmul.mubr.msk.f32.gmra.mxu1 %vm384_vm2, %v4725_v29  ;;  %3957 = vmatprep.mubr.msk.f32.mxu0 %vm384_vm2, %v4728_v45  ;;  %6269 = vst [vmem:[#allocation26_spill] sm:$0xff] %v4771_v23  ;;  %v337_v29 = vrot.slane %v4744_v24, 1  ;;  %v338_v45 = vrot.slane %v4747_v40, 1  ;;  %v378_v18 = vrot.slane %v4755_v62, 1  ;;  %v4794_v22 = vsel %vm301_vm1, %v333_v12, %v335_v43 }
  0x28   : > { %3981 = vmatprep.mubr.msk.f32.mxu1 %vm384_vm2, %v4736_v50  ;;  %6270 = vst [vmem:[#allocation27_spill] sm:$0xff] %v4780_v44  ;;  %v4785_v52 = vld [vmem:[%s4463_s26 + $0x178] sm:$0x3]  ;;  %6271 = vst [vmem:[#allocation28_spill] sm:$0xff] %v4794_v22  ;;  %v340_v37 = vrot.slane %v4777_v56, 1  ;;  %v971_v50 = vrot.slane %v4466_v3, 2  ;;  %v4801_v62 = vsel %vm301_vm1, %v373_v9, %v375_v36 }
  0x29   : > { %6272 = vst [vmem:[#allocation29_spill] sm:$0xff] %v4801_v62  ;;  %v4809_v43 = vsel %vm301_vm1, %v377_v42, %v378_v18  ;;  %v974_v12 = vrot.slane %v4481_v10, 2  ;;  %v976_v10 = vrot.slane %v4489_v14, 2  ;;  %v977_v42 = vrot.slane %v4494_v17, 2 }
  0x2a   : > { %3958 = vmatmul.mubr.msk.f32.gmra.mxu0 %vm384_vm2, %v4762_v7  ;;  %v4804_v7 = vsel %vm301_vm1, %v337_v29, %v338_v45  ;;  %6274 = vst [vmem:[#allocation31_spill] sm:$0xff] %v4809_v43  ;;  %v4819_v29 = vsel %vm301_vm1, %v338_v45, %v340_v37  ;;  %v979_v37 = vrot.slane %v4516_v26, 2  ;;  %v984_v26 = vrot.slane %v4557_v41, 2 }
  0x2b   : > { %3982 = vmatmul.mubr.msk.f32.gmra.mxu1 %vm384_vm2, %v4765_v49  ;;  %3960 = vmatprep.mubr.msk.f32.mxu0 %vm384_vm2, %v4771_v23  ;;  %6273 = vst [vmem:[#allocation30_spill] sm:$0xff] %v4804_v7  ;;  %v380_v49 = vrot.slane %v4785_v52, 1  ;;  %v972_v23 = vrot.slane %v4469_v4, 2  ;;  %6275 = vst [vmem:[#allocation32_spill] sm:$0xff] %v4819_v29  ;;  %v989_v41 = vrot.slane %v4609_v60, 2 }
  0x2c   : > { %3984 = vmatprep.mubr.msk.f32.mxu1 %vm384_vm2, %v4780_v44 }
  0x2d   : > { %v4824_v36 = vsel %vm301_vm1, %v378_v18, %v380_v49  ;;  %v973_v9 = vsel %vm970_vm3, %v971_v50, %v972_v23  ;;  %v975_v45 = vsel %vm970_vm3, %v972_v23, %v974_v12  ;;  %v981_v49 = vrot.slane %v4536_v33, 2  ;;  %v4860_v23 = vld [vmem:[%s6159_s1 + $0x18] sm:$0xf] }
  0x2e   : > { %3961 = vmatmul.mubr.msk.f32.gmra.mxu0 %vm384_vm2, %v4794_v22  ;;  %6276 = vst [vmem:[#allocation33_spill] sm:$0xff] %v4824_v36  ;;  %v982_v50 = vrot.slane %v4539_v34, 2  ;;  %v4842_v18 = vsel %vm970_vm3, %v976_v10, %v977_v42  ;;  %v987_v12 = vrot.slane %v4579_v48, 2 }
  0x2f   : > { %3985 = vmatmul.mubr.msk.f32.gmra.mxu1 %vm384_vm2, %v4801_v62  ;;  %3963 = vmatprep.mubr.msk.f32.mxu0 %vm384_vm2, %v4804_v7 }
  0x30   : > { %3987 = vmatprep.mubr.msk.f32.mxu1 %vm384_vm2, %v4809_v43  ;;  %v4901_v60 = vsel %vm970_vm3, %v987_v12, %v989_v41  ;;  %v1001_v41 = vrot.slane %v4700_v59, 2 }
  0x32   : > { %3964 = vmatmul.mubr.msk.f32.gmra.mxu0 %vm384_vm2, %v4819_v29 }
  0x33   : > { %3988 = vmatmul.mubr.msk.f32.gmra.mxu1 %vm384_vm2, %v4824_v36  ;;  %4042 = vmatprep.mubr.msk.f32.mxu0 %vm384_vm2, %v973_v9  ;;  %v4847_v9 = vld [vmem:[%s6159_s1 + $0x14] sm:$0xf] }
  0x34   : > { %3992 = vmatprep.mubr.msk.f32.mxu1 %vm384_vm2, %v4466_v3  ;;  %v4854_v3 = vsel %vm970_vm3, %v977_v42, %v979_v37  ;;  %v991_v42 = vrot.slane %v4596_v55, 2  ;;  %v994_v37 = vrot.slane %v4645_v15, 2 }
  0x36   : > { %4043 = vmatmul.mubr.msk.f32.vlgmr.msra.gmra.mxu0 %vm384_vm2, %v975_v45  ;;  %v992_v45 = vrot.slane %v4612_v61, 2 }
  0x37   : > { %3993 = vmatmul.mubr.msk.f32.vlgmr.msra.gmra.mxu1 %vm384_vm2, %v4469_v4  ;;  %4141 = vmatpush3.msk.msra.mxu0 %vm449_vm0, %v4524_v28  ;;  %v4867_v4 = vsel %vm970_vm3, %v981_v49, %v982_v50  ;;  %v986_v28 = vrot.slane %v4576_v47, 2 }
  0x38   : > { %4091 = vmatpush3.msk.msra.mxu1 %vm449_vm0, %v4506_v21  ;;  %3995 = vmatprep.mubr.msk.f32.mxu1 %vm384_vm2, %v4489_v14  ;;  %v4884_v21 = vsel %vm970_vm3, %v982_v50, %v984_v26  ;;  %v4907_v49 = vsel %vm970_vm3, %v991_v42, %v992_v45  ;;  %v996_v50 = vrot.slane %v4656_v25, 2  ;;  %v997_v26 = vrot.slane %v4659_v30, 2 }
  0x39   : > { %4045 = vmatprep.mubr.msk.f32.mxu0 %vm384_vm2, %v4842_v18  ;;  %4190 = vmatprep.subr.msk.mxu1 %vm449_vm0, %v4847_v9  ;;  %v4890_v10 = vsel %vm970_vm3, %v986_v28, %v987_v12  ;;  %v4918_v15 = vsel %vm970_vm3, %v992_v45, %v994_v37  ;;  %v999_v28 = vrot.slane %v4689_v57, 2  ;;  %v1002_v42 = vrot.slane %v4703_v1, 2 }
  0x3a   : > { %4046 = vmatmul.mubr.msk.f32.gmra.mxu0 %vm384_vm2, %v4854_v3  ;;  %4240 = vmatprep.subr.msk.mxu0 %vm449_vm0, %v4860_v23  ;;  %6277 = vst [vmem:[#allocation34_spill] sm:$0xff] %v4918_v15  ;;  %v4924_v12 = vsel %vm970_vm3, %v996_v50, %v997_v26  ;;  %v1004_v45 = vrot.slane %v4733_v38, 2  ;;  %v1006_v50 = vrot.slane %v4744_v24, 2 }
  0x3b   : > { %3996 = vmatmul.mubr.msk.f32.gmra.mxu1 %vm384_vm2, %v4494_v17  ;;  %4048 = vmatprep.mubr.msk.f32.mxu0 %vm384_vm2, %v4867_v4  ;;  %v4935_v57 = vsel %vm970_vm3, %v997_v26, %v999_v28  ;;  %v4941_v37 = vsel %vm970_vm3, %v1001_v41, %v1002_v42  ;;  %v1009_v26 = vrot.slane %v4777_v56, 2  ;;  %v1011_v41 = vrot.slane %v4472_v5, 2 }
  0x3c   : > { %3998 = vmatprep.mubr.msk.f32.mxu1 %vm384_vm2, %v4536_v33  ;;  %6278 = vst [vmem:[#allocation35_spill] sm:$0xff] %v4935_v57  ;;  %v4952_v38 = vsel %vm970_vm3, %v1002_v42, %v1004_v45  ;;  %v1014_v42 = vrot.slane %v4486_v13, 2 }
  0x3d   : > { %6279 = vst [vmem:[#allocation36_spill] sm:$0xff] %v4952_v38 }
  0x3e   : > { %4049 = vmatmul.mubr.msk.f32.gmra.mxu0 %vm384_vm2, %v4884_v21 }
  0x3f   : > { %3999 = vmatmul.mubr.msk.f32.gmra.mxu1 %vm384_vm2, %v4539_v34  ;;  %4051 = vmatprep.mubr.msk.f32.mxu0 %vm384_vm2, %v4890_v10 }
  0x40   : > { %4001 = vmatprep.mubr.msk.f32.mxu1 %vm384_vm2, %v4576_v47 }
  0x42   : > { %4052 = vmatmul.mubr.msk.f32.gmra.mxu0 %vm384_vm2, %v4901_v60 }
  0x43   : > { %4002 = vmatmul.mubr.msk.f32.gmra.mxu1 %vm384_vm2, %v4579_v48  ;;  %4054 = vmatprep.mubr.msk.f32.mxu0 %vm384_vm2, %v4907_v49 }
  0x44   : > { %4004 = vmatprep.mubr.msk.f32.mxu1 %vm384_vm2, %v4596_v55 }
  0x46   : > { %4055 = vmatmul.mubr.msk.f32.gmra.mxu0 %vm384_vm2, %v4918_v15  ;;  %v1007_v15 = vrot.slane %v4747_v40, 2 }
  0x47   : > { %4005 = vmatmul.mubr.msk.f32.gmra.mxu1 %vm384_vm2, %v4612_v61  ;;  %4057 = vmatprep.mubr.msk.f32.mxu0 %vm384_vm2, %v4924_v12 }
  0x48   : > { %4007 = vmatprep.mubr.msk.f32.mxu1 %vm384_vm2, %v4656_v25  ;;  %v4958_v28 = vsel %vm970_vm3, %v1006_v50, %v1007_v15  ;;  %v4969_v56 = vsel %vm970_vm3, %v1007_v15, %v1009_v26  ;;  %v1016_v50 = vrot.slane %v4498_v19, 2  ;;  %v1019_v15 = vrot.slane %v4519_v27, 2 }
  0x49   : > { %6280 = vst [vmem:[#allocation37_spill] sm:$0xff] %v4969_v56 }
  0x4a   : > { %4058 = vmatmul.mubr.msk.f32.gmra.mxu0 %vm384_vm2, %v4935_v57  ;;  %v1012_v57 = vrot.slane %v4477_v8, 2 }
  0x4b   : > { %4008 = vmatmul.mubr.msk.f32.gmra.mxu1 %vm384_vm2, %v4659_v30  ;;  %4060 = vmatprep.mubr.msk.f32.mxu0 %vm384_vm2, %v4941_v37 }
  0x4c   : > { %4010 = vmatprep.mubr.msk.f32.mxu1 %vm384_vm2, %v4700_v59  ;;  %v4975_v45 = vsel %vm970_vm3, %v1011_v41, %v1012_v57  ;;  %v4986_v13 = vsel %vm970_vm3, %v1012_v57, %v1014_v42  ;;  %v1021_v41 = vrot.slane %v4542_v35, 2  ;;  %v1024_v57 = vrot.slane %v4573_v46, 2 }
  0x4d   : > { %6281 = vst [vmem:[#allocation38_spill] sm:$0xff] %v4986_v13 }
  0x4e   : > { %4061 = vmatmul.mubr.msk.f32.gmra.mxu0 %vm384_vm2, %v4952_v38  ;;  %v1017_v38 = vrot.slane %v4501_v20, 2 }
  0x4f   : > { %4011 = vmatmul.mubr.msk.f32.gmra.mxu1 %vm384_vm2, %v4703_v1  ;;  %4063 = vmatprep.mubr.msk.f32.mxu0 %vm384_vm2, %v4958_v28 }
  0x50   : > { %4013 = vmatprep.mubr.msk.f32.mxu1 %vm384_vm2, %v4744_v24  ;;  %v4992_v26 = vsel %vm970_vm3, %v1016_v50, %v1017_v38  ;;  %v5003_v27 = vsel %vm970_vm3, %v1017_v38, %v1019_v15  ;;  %v1026_v50 = vrot.slane %v4590_v53, 2  ;;  %v1029_v38 = vrot.slane %v4625_v0, 2 }
  0x51   : > { %6282 = vst [vmem:[#allocation39_spill] sm:$0xff] %v5003_v27 }
  0x52   : > { %4064 = vmatmul.mubr.msk.f32.gmra.mxu0 %vm384_vm2, %v4969_v56  ;;  %v1022_v56 = vrot.slane %v4553_v39, 2 }
  0x53   : > { %4014 = vmatmul.mubr.msk.f32.gmra.mxu1 %vm384_vm2, %v4747_v40  ;;  %4066 = vmatprep.mubr.msk.f32.mxu0 %vm384_vm2, %v4975_v45 }
  0x54   : > { %4016 = vmatprep.mubr.msk.f32.mxu1 %vm384_vm2, %v4472_v5  ;;  %v5009_v42 = vsel %vm970_vm3, %v1021_v41, %v1022_v56  ;;  %v5020_v46 = vsel %vm970_vm3, %v1022_v56, %v1024_v57  ;;  %v1031_v41 = vrot.slane %v4629_v2, 2  ;;  %v1034_v56 = vrot.slane %v4648_v16, 2 }
  0x55   : > { %6283 = vst [vmem:[#allocation40_spill] sm:$0xff] %v5020_v46 }
  0x56   : > { %4067 = vmatmul.mubr.msk.f32.gmra.mxu0 %vm384_vm2, %v4986_v13  ;;  %v1027_v13 = vrot.slane %v4593_v54, 2 }
  0x57   : > { %4017 = vmatmul.mubr.msk.f32.gmra.mxu1 %vm384_vm2, %v4477_v8  ;;  %4069 = vmatprep.mubr.msk.f32.mxu0 %vm384_vm2, %v4992_v26 }
  0x58   : > { %4019 = vmatprep.mubr.msk.f32.mxu1 %vm384_vm2, %v4498_v19  ;;  %v5026_v15 = vsel %vm970_vm3, %v1026_v50, %v1027_v13  ;;  %v5037_v0 = vsel %vm970_vm3, %v1027_v13, %v1029_v38  ;;  %v1036_v50 = vrot.slane %v4664_v31, 2  ;;  %v1039_v13 = vrot.slane %v4692_v58, 2 }
  0x59   : > { %6284 = vst [vmem:[#allocation41_spill] sm:$0xff] %v5026_v15  ;;  %6285 = vst [vmem:[#allocation42_spill] sm:$0xff] %v5037_v0 }
  0x5a   : > { %4070 = vmatmul.mubr.msk.f32.gmra.mxu0 %vm384_vm2, %v5003_v27  ;;  %v1032_v27 = vrot.slane %v4632_v6, 2 }
  0x5b   : > { %4020 = vmatmul.mubr.msk.f32.gmra.mxu1 %vm384_vm2, %v4501_v20  ;;  %4072 = vmatprep.mubr.msk.f32.mxu0 %vm384_vm2, %v5009_v42 }
  0x5c   : > { %4022 = vmatprep.mubr.msk.f32.mxu1 %vm384_vm2, %v4542_v35  ;;  %v5043_v57 = vsel %vm970_vm3, %v1031_v41, %v1032_v27  ;;  %v5054_v16 = vsel %vm970_vm3, %v1032_v27, %v1034_v56  ;;  %v1041_v41 = vrot.slane %v4708_v11, 2  ;;  %v1044_v27 = vrot.slane %v4741_v63, 2 }
  0x5d   : > { %6286 = vst [vmem:[#allocation43_spill] sm:$0xff] %v5043_v57  ;;  %6287 = vst [vmem:[#allocation44_spill] sm:$0xff] %v5054_v16 }
  0x5e   : > { %4073 = vmatmul.mubr.msk.f32.gmra.mxu0 %vm384_vm2, %v5020_v46  ;;  %v1037_v46 = vrot.slane %v4667_v32, 2 }
  0x5f   : > { %4023 = vmatmul.mubr.msk.f32.gmra.mxu1 %vm384_vm2, %v4553_v39  ;;  %4075 = vmatprep.mubr.msk.f32.mxu0 %vm384_vm2, %v5026_v15 }
  0x60   : > { %4025 = vmatprep.mubr.msk.f32.mxu1 %vm384_vm2, %v4590_v53  ;;  %v5060_v38 = vsel %vm970_vm3, %v1036_v50, %v1037_v46  ;;  %v5071_v58 = vsel %vm970_vm3, %v1037_v46, %v1039_v13  ;;  %v1046_v50 = vrot.slane %v4752_v51, 2  ;;  %v1049_v46 = vrot.slane %v4785_v52, 2  ;;  %v6291_v52 = vld [vmem:[#allocation4_spill] sm:$0xff] }
  0x62   : > { %4076 = vmatmul.mubr.msk.f32.gmra.mxu0 %vm384_vm2, %v5037_v0  ;;  %v6288_v0 = vld [vmem:[#allocation18_spill] sm:$0xff] }
  0x63   : > { %4026 = vmatmul.mubr.msk.f32.gmra.mxu1 %vm384_vm2, %v4593_v54  ;;  %4078 = vmatprep.mubr.msk.f32.mxu0 %vm384_vm2, %v5043_v57  ;;  %v1042_v15 = vrot.slane %v6288_v0, 2 }
  0x64   : > { %4028 = vmatprep.mubr.msk.f32.mxu1 %vm384_vm2, %v4629_v2 }
  0x65   : > { %v5077_v56 = vsel %vm970_vm3, %v1041_v41, %v1042_v15  ;;  %v5088_v63 = vsel %vm970_vm3, %v1042_v15, %v1044_v27  ;;  %v6292_v41 = vld [vmem:[#allocation6_spill] sm:$0xff] }
  0x66   : > { %4079 = vmatmul.mubr.msk.f32.gmra.mxu0 %vm384_vm2, %v5054_v16  ;;  %v6289_v16 = vld [vmem:[#allocation23_spill] sm:$0xff]  ;;  %v5129_v27 = vld [vmem:[%s6159_s1 + $0x20] sm:$0xf] }
  0x67   : > { %4029 = vmatmul.mubr.msk.f32.gmra.mxu1 %vm384_vm2, %v4632_v6  ;;  %4081 = vmatprep.mubr.msk.f32.mxu0 %vm384_vm2, %v5060_v38  ;;  %v1047_v57 = vrot.slane %v6289_v16, 2 }
  0x68   : > { %4031 = vmatprep.mubr.msk.f32.mxu1 %vm384_vm2, %v4664_v31 }
  0x69   : > { %v5094_v13 = vsel %vm970_vm3, %v1046_v50, %v1047_v57  ;;  %v5103_v15 = vsel %vm970_vm3, %v1047_v57, %v1049_v46  ;;  %v5120_v57 = vld [vmem:[%s6159_s1 + $0x1c] sm:$0xf]  ;;  %v6297_v50 = vld [vmem:[#allocation16_spill] sm:$0xff]  ;;  %v6298_v46 = vld [vmem:[#allocation19_spill] sm:$0xff] }
  0x6a   : > { %4082 = vmatmul.mubr.msk.f32.gmra.mxu0 %vm384_vm2, %v5071_v58  ;;  %6290 = vst [vmem:[#allocation18_spill] sm:$0xff] %v5103_v15 }
  0x6b   : > { %4032 = vmatmul.mubr.msk.f32.gmra.mxu1 %vm384_vm2, %v4667_v32  ;;  %4084 = vmatprep.mubr.msk.f32.mxu0 %vm384_vm2, %v5077_v56 }
  0x6c   : > { %4034 = vmatprep.mubr.msk.f32.mxu1 %vm384_vm2, %v4708_v11 }
  0x6e   : > { %4085 = vmatmul.mubr.msk.f32.gmra.mxu0 %vm384_vm2, %v5088_v63 }
  0x6f   : > { %4035 = vmatmul.mubr.msk.f32.gmra.mxu1 %vm384_vm2, %v6288_v0  ;;  %4087 = vmatprep.mubr.msk.f32.mxu0 %vm384_vm2, %v5094_v13 }
  0x70   : > { %4037 = vmatprep.mubr.msk.f32.mxu1 %vm384_vm2, %v4752_v51 }
  0x72   : > { %4088 = vmatmul.mubr.msk.f32.gmra.mxu0 %vm384_vm2, %v5103_v15 }
  0x73   : > { %4038 = vmatmul.mubr.msk.f32.gmra.mxu1 %vm384_vm2, %v6289_v16  ;;  %4142 = vmatprep.mubr.msk.f32.mxu0 %vm384_vm2, %v6291_v52  ;;  %v6299_v52 = vld [vmem:[#allocation21_spill] sm:$0xff] }
  0x74   : > { %4092 = vmatprep.mubr.msk.f32.mxu1 %vm384_vm2, %v4489_v14  ;;  %v6293_v14 = vld [vmem:[#allocation8_spill] sm:$0xff] }
  0x76   : > { %4143 = vmatmul.mubr.msk.f32.vlgmr.msra.gmra.mxu0 %vm384_vm2, %v6292_v41  ;;  %v6300_v41 = vld [vmem:[#allocation24_spill] sm:$0xff] }
  0x77   : > { %4093 = vmatmul.mubr.msk.f32.vlgmr.msra.gmra.mxu1 %vm384_vm2, %v4494_v17  ;;  %4241 = vmatpush3.msk.msra.mxu0 %vm449_vm0, %v4860_v23  ;;  %v6294_v17 = vld [vmem:[#allocation10_spill] sm:$0xff]  ;;  %v6295_v23 = vld [vmem:[#allocation12_spill] sm:$0xff] }
  0x78   : > { %4191 = vmatpush3.msk.msra.mxu1 %vm449_vm0, %v4847_v9  ;;  %4095 = vmatprep.mubr.msk.f32.mxu1 %vm384_vm2, %v4536_v33  ;;  %v6296_v9 = vld [vmem:[#allocation14_spill] sm:$0xff] }
  0x79   : > { %4145 = vmatprep.mubr.msk.f32.mxu0 %vm384_vm2, %v6293_v14  ;;  %4290 = vmatprep.subr.msk.mxu1 %vm449_vm0, %v5120_v57 }
  0x7a   : > { %4146 = vmatmul.mubr.msk.f32.gmra.mxu0 %vm384_vm2, %v6294_v17  ;;  %4340 = vmatprep.subr.msk.mxu0 %vm449_vm0, %v5129_v27 }
  0x7b   : > { %4096 = vmatmul.mubr.msk.f32.gmra.mxu1 %vm384_vm2, %v4539_v34  ;;  %4148 = vmatprep.mubr.msk.f32.mxu0 %vm384_vm2, %v6295_v23 }
  0x7c   : > { %4098 = vmatprep.mubr.msk.f32.mxu1 %vm384_vm2, %v4576_v47 }
  0x7e   : > { %4149 = vmatmul.mubr.msk.f32.gmra.mxu0 %vm384_vm2, %v6296_v9 }
  0x7f   : > { %4099 = vmatmul.mubr.msk.f32.gmra.mxu1 %vm384_vm2, %v4579_v48  ;;  %4151 = vmatprep.mubr.msk.f32.mxu0 %vm384_vm2, %v6297_v50  ;;  %v6301_v50 = vld [vmem:[#allocation26_spill] sm:$0xff] }
  0x80   : > { %4101 = vmatprep.mubr.msk.f32.mxu1 %vm384_vm2, %v4596_v55 }
  0x82   : > { %4152 = vmatmul.mubr.msk.f32.gmra.mxu0 %vm384_vm2, %v6298_v46 }
  0x83   : > { %4102 = vmatmul.mubr.msk.f32.gmra.mxu1 %vm384_vm2, %v4612_v61  ;;  %4154 = vmatprep.mubr.msk.f32.mxu0 %vm384_vm2, %v6299_v52  ;;  %v5246_v52 = vld [vmem:[%s4463_s26 + $0x190] sm:$0x3] }
  0x84   : > { %4104 = vmatprep.mubr.msk.f32.mxu1 %vm384_vm2, %v4656_v25 }
  0x86   : > { %4155 = vmatmul.mubr.msk.f32.gmra.mxu0 %vm384_vm2, %v6300_v41  ;;  %v5233_v41 = vld [vmem:[%s4463_s26 + $0x188] sm:$0xff] }
  0x87   : > { %4105 = vmatmul.mubr.msk.f32.gmra.mxu1 %vm384_vm2, %v4659_v30  ;;  %4157 = vmatprep.mubr.msk.f32.mxu0 %vm384_vm2, %v6301_v50  ;;  %v6302_v50 = vld [vmem:[#allocation2_spill] sm:$0xff] }
  0x88   : > { %4107 = vmatprep.mubr.msk.f32.mxu1 %vm384_vm2, %v4700_v59 }
  0x8a   : > { %4158 = vmatmul.mubr.msk.f32.gmra.mxu0 %vm384_vm2, %v4794_v22  ;;  %v6303_v22 = vld [vmem:[#allocation3_spill] sm:$0xff] }
  0x8b   : > { %4108 = vmatmul.mubr.msk.f32.gmra.mxu1 %vm384_vm2, %v4703_v1  ;;  %4160 = vmatprep.mubr.msk.f32.mxu0 %vm384_vm2, %v4804_v7  ;;  %v6304_v7 = vld [vmem:[#allocation5_spill] sm:$0xff] }
  0x8c   : > { %4110 = vmatprep.mubr.msk.f32.mxu1 %vm384_vm2, %v4744_v24 }
  0x8e   : > { %4161 = vmatmul.mubr.msk.f32.gmra.mxu0 %vm384_vm2, %v4819_v29  ;;  %v6305_v29 = vld [vmem:[#allocation7_spill] sm:$0xff] }
  0x8f   : > { %4111 = vmatmul.mubr.msk.f32.gmra.mxu1 %vm384_vm2, %v4747_v40  ;;  %4163 = vmatprep.mubr.msk.f32.mxu0 %vm384_vm2, %v6302_v50  ;;  %v6306_v50 = vld [vmem:[#allocation9_spill] sm:$0xff] }
  0x90   : > { %4113 = vmatprep.mubr.msk.f32.mxu1 %vm384_vm2, %v4472_v5 }
  0x92   : > { %4164 = vmatmul.mubr.msk.f32.gmra.mxu0 %vm384_vm2, %v6303_v22  ;;  %v6307_v22 = vld [vmem:[#allocation11_spill] sm:$0xff] }
  0x93   : > { %4114 = vmatmul.mubr.msk.f32.gmra.mxu1 %vm384_vm2, %v4477_v8  ;;  %4166 = vmatprep.mubr.msk.f32.mxu0 %vm384_vm2, %v6304_v7  ;;  %v6308_v7 = vld [vmem:[#allocation13_spill] sm:$0xff] }
  0x94   : > { %4116 = vmatprep.mubr.msk.f32.mxu1 %vm384_vm2, %v4498_v19 }
  0x96   : > { %4167 = vmatmul.mubr.msk.f32.gmra.mxu0 %vm384_vm2, %v6305_v29  ;;  %v6309_v29 = vld [vmem:[#allocation15_spill] sm:$0xff] }
  0x97   : > { %4117 = vmatmul.mubr.msk.f32.gmra.mxu1 %vm384_vm2, %v4501_v20  ;;  %4169 = vmatprep.mubr.msk.f32.mxu0 %vm384_vm2, %v6306_v50  ;;  %v6310_v50 = vld [vmem:[#allocation17_spill] sm:$0xff] }
  0x98   : > { %4119 = vmatprep.mubr.msk.f32.mxu1 %vm384_vm2, %v4542_v35 }
  0x9a   : > { %4170 = vmatmul.mubr.msk.f32.gmra.mxu0 %vm384_vm2, %v6307_v22  ;;  %v6311_v22 = vld [vmem:[#allocation20_spill] sm:$0xff] }
  0x9b   : > { %4120 = vmatmul.mubr.msk.f32.gmra.mxu1 %vm384_vm2, %v4553_v39  ;;  %4172 = vmatprep.mubr.msk.f32.mxu0 %vm384_vm2, %v6308_v7  ;;  %v6312_v7 = vld [vmem:[#allocation22_spill] sm:$0xff] }
  0x9c   : > { %4122 = vmatprep.mubr.msk.f32.mxu1 %vm384_vm2, %v4590_v53 }
  0x9e   : > { %4173 = vmatmul.mubr.msk.f32.gmra.mxu0 %vm384_vm2, %v6309_v29  ;;  %v5230_v29 = vld [vmem:[%s4463_s26 + $0x180] sm:$0xff] }
  0x9f   : > { %4123 = vmatmul.mubr.msk.f32.gmra.mxu1 %vm384_vm2, %v4593_v54  ;;  %4175 = vmatprep.mubr.msk.f32.mxu0 %vm384_vm2, %v6310_v50  ;;  %v6313_v50 = vld [vmem:[#allocation25_spill] sm:$0xff] }
  0xa0   : > { %4125 = vmatprep.mubr.msk.f32.mxu1 %vm384_vm2, %v4629_v2 }
  0xa2   : > { %4176 = vmatmul.mubr.msk.f32.gmra.mxu0 %vm384_vm2, %v6311_v22  ;;  %v1647_v22 = vrot.slane %v5233_v41, 1 }
  0xa3   : > { %4126 = vmatmul.mubr.msk.f32.gmra.mxu1 %vm384_vm2, %v4632_v6  ;;  %4178 = vmatprep.mubr.msk.f32.mxu0 %vm384_vm2, %v6312_v7  ;;  %v1646_v7 = vrot.slane %v5230_v29, 1 }
  0xa4   : > { %4128 = vmatprep.mubr.msk.f32.mxu1 %vm384_vm2, %v4664_v31 }
  0xa6   : > { %4179 = vmatmul.mubr.msk.f32.gmra.mxu0 %vm384_vm2, %v6313_v50  ;;  %v5258_v50 = vsel %vm301_vm1, %v1646_v7, %v1647_v22 }
  0xa7   : > { %4129 = vmatmul.mubr.msk.f32.gmra.mxu1 %vm384_vm2, %v4667_v32  ;;  %4181 = vmatprep.mubr.msk.f32.mxu0 %vm384_vm2, %v4780_v44  ;;  %v1649_v44 = vrot.slane %v5246_v52, 1  ;;  %6314 = vst [vmem:[#allocation23_spill] sm:$0xff] %v5258_v50 }
  0xa8   : > { %4131 = vmatprep.mubr.msk.f32.mxu1 %vm384_vm2, %v4708_v11 }
  0xaa   : > { %4182 = vmatmul.mubr.msk.f32.gmra.mxu0 %vm384_vm2, %v4801_v62  ;;  %v5267_v62 = vsel %vm301_vm1, %v1647_v22, %v1649_v44  ;;  %v6326_v22 = vld [vmem:[#allocation44_spill] sm:$0xff] }
  0xab   : > { %4132 = vmatmul.mubr.msk.f32.gmra.mxu1 %vm384_vm2, %v6288_v0  ;;  %4184 = vmatprep.mubr.msk.f32.mxu0 %vm384_vm2, %v4809_v43  ;;  %6315 = vst [vmem:[#allocation4_spill] sm:$0xff] %v5267_v62 }
  0xac   : > { %4134 = vmatprep.mubr.msk.f32.mxu1 %vm384_vm2, %v4752_v51 }
  0xae   : > { %4185 = vmatmul.mubr.msk.f32.gmra.mxu0 %vm384_vm2, %v4824_v36  ;;  %v5444_v36 = vld [vmem:[%s4463_s26 + $0x198] sm:$0xff] }
  0xaf   : > { %4135 = vmatmul.mubr.msk.f32.gmra.mxu1 %vm384_vm2, %v6289_v16  ;;  %4187 = vmatprep.mubr.msk.f32.mxu0 %vm384_vm2, %v5258_v50 }
  0xb0   : > { %4137 = vmatprep.mubr.msk.f32.mxu1 %vm384_vm2, %v5230_v29 }
  0xb2   : > { %4188 = vmatmul.mubr.msk.f32.gmra.mxu0 %vm384_vm2, %v5267_v62 }
  0xb3   : > { %4138 = vmatmul.mubr.msk.f32.gmra.mxu1 %vm384_vm2, %v5233_v41  ;;  %4242 = vmatprep.mubr.msk.f32.mxu0 %vm384_vm2, %v4536_v33  ;;  %v6316_v33 = vld [vmem:[#allocation34_spill] sm:$0xff] }
  0xb4   : > { %4192 = vmatprep.mubr.msk.f32.mxu1 %vm384_vm2, %v4842_v18 }
  0xb6   : > { %4243 = vmatmul.mubr.msk.f32.vlgmr.msra.gmra.mxu0 %vm384_vm2, %v4539_v34  ;;  %v6317_v34 = vld [vmem:[#allocation35_spill] sm:$0xff] }
  0xb7   : > { %4193 = vmatmul.mubr.msk.f32.vlgmr.msra.gmra.mxu1 %vm384_vm2, %v4854_v3  ;;  %4341 = vmatpush3.msk.msra.mxu0 %vm449_vm0, %v5129_v27 }
  0xb8   : > { %4291 = vmatpush3.msk.msra.mxu1 %vm449_vm0, %v5120_v57  ;;  %4195 = vmatprep.mubr.msk.f32.mxu1 %vm384_vm2, %v4867_v4  ;;  %v1917_v57 = vrot.slane %v5230_v29, 2 }
  0xb9   : > { %4245 = vmatprep.mubr.msk.f32.mxu0 %vm384_vm2, %v4576_v47  ;;  %v6318_v47 = vld [vmem:[#allocation36_spill] sm:$0xff] }
  0xba   : > { %4246 = vmatmul.mubr.msk.f32.gmra.mxu0 %vm384_vm2, %v4579_v48  ;;  %v6319_v48 = vld [vmem:[#allocation37_spill] sm:$0xff] }
  0xbb   : > { %4196 = vmatmul.mubr.msk.f32.gmra.mxu1 %vm384_vm2, %v4884_v21  ;;  %4248 = vmatprep.mubr.msk.f32.mxu0 %vm384_vm2, %v4596_v55  ;;  %v6320_v55 = vld [vmem:[#allocation38_spill] sm:$0xff] }
  0xbc   : > { %4198 = vmatprep.mubr.msk.f32.mxu1 %vm384_vm2, %v4890_v10 }
  0xbe   : > { %4249 = vmatmul.mubr.msk.f32.gmra.mxu0 %vm384_vm2, %v4612_v61 }
  0xbf   : > { %4199 = vmatmul.mubr.msk.f32.gmra.mxu1 %vm384_vm2, %v4901_v60  ;;  %4251 = vmatprep.mubr.msk.f32.mxu0 %vm384_vm2, %v4656_v25  ;;  %v6322_v25 = vld [vmem:[#allocation40_spill] sm:$0xff] }
  0xc0   : > { %4201 = vmatprep.mubr.msk.f32.mxu1 %vm384_vm2, %v4907_v49 }
  0xc2   : > { %4252 = vmatmul.mubr.msk.f32.gmra.mxu0 %vm384_vm2, %v4659_v30  ;;  %v6323_v30 = vld [vmem:[#allocation41_spill] sm:$0xff] }
  0xc3   : > { %4202 = vmatmul.mubr.msk.f32.gmra.mxu1 %vm384_vm2, %v6316_v33  ;;  %4254 = vmatprep.mubr.msk.f32.mxu0 %vm384_vm2, %v4700_v59 }
  0xc4   : > { %4204 = vmatprep.mubr.msk.f32.mxu1 %vm384_vm2, %v4924_v12 }
  0xc6   : > { %4255 = vmatmul.mubr.msk.f32.gmra.mxu0 %vm384_vm2, %v4703_v1 }
  0xc7   : > { %4205 = vmatmul.mubr.msk.f32.gmra.mxu1 %vm384_vm2, %v6317_v34  ;;  %4257 = vmatprep.mubr.msk.f32.mxu0 %vm384_vm2, %v4744_v24  ;;  %v6324_v24 = vld [vmem:[#allocation42_spill] sm:$0xff] }
  0xc8   : > { %4207 = vmatprep.mubr.msk.f32.mxu1 %vm384_vm2, %v4941_v37 }
  0xca   : > { %4258 = vmatmul.mubr.msk.f32.gmra.mxu0 %vm384_vm2, %v4747_v40  ;;  %v6325_v40 = vld [vmem:[#allocation43_spill] sm:$0xff] }
  0xcb   : > { %4208 = vmatmul.mubr.msk.f32.gmra.mxu1 %vm384_vm2, %v6318_v47  ;;  %4260 = vmatprep.mubr.msk.f32.mxu0 %vm384_vm2, %v4472_v5 }
  0xcc   : > { %4210 = vmatprep.mubr.msk.f32.mxu1 %vm384_vm2, %v4958_v28 }
  0xce   : > { %4261 = vmatmul.mubr.msk.f32.gmra.mxu0 %vm384_vm2, %v4477_v8 }
  0xcf   : > { %4211 = vmatmul.mubr.msk.f32.gmra.mxu1 %vm384_vm2, %v6319_v48  ;;  %4263 = vmatprep.mubr.msk.f32.mxu0 %vm384_vm2, %v4498_v19  ;;  %v6321_v19 = vld [vmem:[#allocation39_spill] sm:$0xff] }
  0xd0   : > { %4213 = vmatprep.mubr.msk.f32.mxu1 %vm384_vm2, %v4975_v45 }
  0xd2   : > { %4264 = vmatmul.mubr.msk.f32.gmra.mxu0 %vm384_vm2, %v4501_v20 }
  0xd3   : > { %4214 = vmatmul.mubr.msk.f32.gmra.mxu1 %vm384_vm2, %v6320_v55  ;;  %4266 = vmatprep.mubr.msk.f32.mxu0 %vm384_vm2, %v4542_v35 }
  0xd4   : > { %4216 = vmatprep.mubr.msk.f32.mxu1 %vm384_vm2, %v4992_v26 }
  0xd6   : > { %v5347_v5 = vpop.f32.mrf.mxu0  ;;  %4267 = vmatmul.mubr.msk.f32.gmra.mxu0 %vm384_vm2, %v4553_v39 }
  0xd7   : > { %v5351_v8 = vpop.f32.mrf.mxu1  ;;  %4217 = vmatmul.mubr.msk.f32.gmra.mxu1 %vm384_vm2, %v6321_v19  ;;  %4269 = vmatprep.mubr.msk.f32.mxu0 %vm384_vm2, %v4590_v53 }
  0xd8   : > { %v5357_v20 = vpop.f32.mrf.mxu0  ;;  %4219 = vmatprep.mubr.msk.f32.mxu1 %vm384_vm2, %v5009_v42 }
  0xd9   : > { %v5361_v35 = vpop.f32.mrf.mxu1 }
  0xda   : > { %v5363_v61 = vpop.f32.mrf.mxu0  ;;  %4270 = vmatmul.mubr.msk.f32.gmra.mxu0 %vm384_vm2, %v4593_v54 }
  0xdb   : > { %v5367_v39 = vpop.f32.mrf.mxu1  ;;  %4220 = vmatmul.mubr.msk.f32.gmra.mxu1 %vm384_vm2, %v6322_v25  ;;  %4272 = vmatprep.mubr.msk.f32.mxu0 %vm384_vm2, %v4629_v2 }
  0xdc   : > { %v5373_v53 = vpop.f32.mrf.mxu0  ;;  %4222 = vmatprep.mubr.msk.f32.mxu1 %vm384_vm2, %v6323_v30 }
  0xdd   : > { %v5377_v59 = vpop.f32.mrf.mxu1 }
  0xde   : > { %v5379_v1 = vpop.f32.mrf.mxu0  ;;  %4273 = vmatmul.mubr.msk.f32.gmra.mxu0 %vm384_vm2, %v4632_v6 }
  0xdf   : > { %v5383_v54 = vpop.f32.mrf.mxu1  ;;  %4223 = vmatmul.mubr.msk.f32.gmra.mxu1 %vm384_vm2, %v6324_v24  ;;  %4275 = vmatprep.mubr.msk.f32.mxu0 %vm384_vm2, %v4664_v31 }
  0xe0   : > { %v5389_v2 = vpop.f32.mrf.mxu0  ;;  %4225 = vmatprep.mubr.msk.f32.mxu1 %vm384_vm2, %v6325_v40 }
  0xe1   : > { %v5393_v7 = vpop.f32.mrf.mxu1 }
  0xe2   : > { %v5395_v44 = vpop.f32.mrf.mxu0  ;;  %4276 = vmatmul.mubr.msk.f32.gmra.mxu0 %vm384_vm2, %v4667_v32 }
  0xe3   : > { %v5399_v6 = vpop.f32.mrf.mxu1  ;;  %4226 = vmatmul.mubr.msk.f32.gmra.mxu1 %vm384_vm2, %v6326_v22  ;;  %4278 = vmatprep.mubr.msk.f32.mxu0 %vm384_vm2, %v4708_v11 }
  0xe4   : > { %v5405_v31 = vpop.f32.mrf.mxu0  ;;  %4228 = vmatprep.mubr.msk.f32.mxu1 %vm384_vm2, %v5060_v38 }
  0xe5   : > { %v5409_v18 = vpop.f32.mrf.mxu1 }
  0xe6   : > { %v5411_v3 = vpop.f32.mrf.mxu0  ;;  %4279 = vmatmul.mubr.msk.f32.gmra.mxu0 %vm384_vm2, %v6288_v0  ;;  %v1918_v0 = vrot.slane %v5233_v41, 2 }
  0xe7   : > { %v5415_v32 = vpop.f32.mrf.mxu1  ;;  %4229 = vmatmul.mubr.msk.f32.gmra.mxu1 %vm384_vm2, %v5071_v58  ;;  %4281 = vmatprep.mubr.msk.f32.mxu0 %vm384_vm2, %v4752_v51 }
  0xe8   : > { %6327 = vst [vmem:[#allocation6_spill] sm:$0xff] %v5415_v32  ;;  %v5421_v11 = vpop.f32.mrf.mxu0  ;;  %4231 = vmatprep.mubr.msk.f32.mxu1 %vm384_vm2, %v5077_v56  ;;  %v5463_v32 = vld [vmem:[%s4463_s26 + $0x1a0] sm:$0xff] }
  0xe9   : > { %v5426_v27 = vpop.f32.mrf.mxu1 }
  0xea   : > { %6328 = vst [vmem:[#allocation8_spill] sm:$0xff] %v5426_v27  ;;  %v5429_v62 = vpop.f32.mrf.mxu0  ;;  %4282 = vmatmul.mubr.msk.f32.gmra.mxu0 %vm384_vm2, %v6289_v16  ;;  %v1920_v27 = vrot.slane %v5246_v52, 2  ;;  %v5450_v16 = vsel %vm970_vm3, %v1917_v57, %v1918_v0 }
  0xeb   : > { %v5433_v50 = vpop.f32.mrf.mxu1  ;;  %4232 = vmatmul.mubr.msk.f32.gmra.mxu1 %vm384_vm2, %v5088_v63  ;;  %4284 = vmatprep.mubr.msk.f32.mxu0 %vm384_vm2, %v5230_v29  ;;  %6331 = vst [vmem:[#allocation14_spill] sm:$0xff] %v5450_v16 }
  0xec   : > { %6329 = vst [vmem:[#allocation10_spill] sm:$0xff] %v5433_v50  ;;  %v5439_v51 = vpop.f32.mrf.mxu0  ;;  %4234 = vmatprep.mubr.msk.f32.mxu1 %vm384_vm2, %v5094_v13  ;;  %v5470_v57 = vsel %vm970_vm3, %v1918_v0, %v1920_v27 }
  0xed   : > { %v5447_v43 = vpop.f32.mrf.mxu1  ;;  %6333 = vst [vmem:[#allocation34_spill] sm:$0xff] %v5470_v57 }
  0xee   : > { %6330 = vst [vmem:[#allocation12_spill] sm:$0xff] %v5447_v43  ;;  %v5452_v50 = vpop.f32.mrf.mxu0  ;;  %4285 = vmatmul.mubr.msk.f32.gmra.mxu0 %vm384_vm2, %v5233_v41 }
  0xef   : > { %v5456_v29 = vpop.f32.mrf.mxu1  ;;  %4235 = vmatmul.mubr.msk.f32.gmra.mxu1 %vm384_vm2, %v5103_v15  ;;  %4287 = vmatprep.mubr.msk.f32.mxu0 %vm384_vm2, %v5444_v36 }
  0xf0   : > { %6332 = vst [vmem:[#allocation19_spill] sm:$0xff] %v5456_v29  ;;  %v5465_v52 = vpop.f32.mrf.mxu0  ;;  %4237 = vmatprep.mubr.msk.f32.mxu1 %vm384_vm2, %v5450_v16 }
  0xf1   : > { %v5472_v43 = vpop.f32.mrf.mxu1 }
  0xf2   : > { %6334 = vst [vmem:[#allocation35_spill] sm:$0xff] %v5472_v43  ;;  %v5474_v41 = vpop.f32.mrf.mxu0  ;;  %4288 = vmatmul.mubr.msk.f32.gmra.mxu0 %vm384_vm2, %v5463_v32 }
  0xf3   : > { %v5478_v29 = vpop.f32.mrf.mxu1  ;;  %4238 = vmatmul.mubr.msk.f32.gmra.mxu1 %vm384_vm2, %v5470_v57  ;;  %4342 = vmatprep.mubr.msk.f32.mxu0 %vm384_vm2, %v4867_v4 }
  0xf4   : > { %6335 = vst [vmem:[#allocation36_spill] sm:$0xff] %v5478_v29  ;;  %v5484_v15 = vpop.f32.mrf.mxu0  ;;  %4292 = vmatprep.mubr.msk.f32.mxu1 %vm384_vm2, %v6293_v14 }
  0xf5   : > { %v5488_v27 = vpop.f32.mrf.mxu1 }
  0xf6   : > { %6336 = vst [vmem:[#allocation37_spill] sm:$0xff] %v5488_v27  ;;  %v4044_v0 = vpop.f32.mrf.mxu0  ;;  %4343 = vmatmul.mubr.msk.f32.vlgmr.msra.gmra.mxu0 %vm384_vm2, %v4884_v21 }
  0xf7   : > { %v3994_v43 = vpop.f32.mrf.mxu1  ;;  %4293 = vmatmul.mubr.msk.f32.vlgmr.msra.gmra.mxu1 %vm384_vm2, %v6294_v17  ;;  %4345 = vmatprep.mubr.msk.f32.mxu0 %vm384_vm2, %v4890_v10 }
  0xf8   : > { %v817_v4 = vadd.f32 %v3994_v43, %v5347_v5  ;;  %v1186_v29 = vpop.f32.mrf.mxu0  ;;  %4295 = vmatprep.mubr.msk.f32.mxu1 %vm384_vm2, %v6295_v23  ;;  %v6337_v23 = vld [vmem:[#allocation16_spill] sm:$0xff] }
  0xf9   : > { %v811_v14 = vpop.f32.mrf.mxu1 }
  0xfa   : > { %v5499_v57 = vadd.f32 %v4044_v0, %v817_v4  ;;  %v812_v27 = vadd.f32 %v811_v14, %v5357_v20  ;;  %v4047_v16 = vpop.f32.mrf.mxu0  ;;  %4346 = vmatmul.mubr.msk.f32.gmra.mxu0 %vm384_vm2, %v4901_v60  ;;  %v6339_v14 = vld [vmem:[#allocation24_spill] sm:$0xff] }
  0xfb   : > { %v3997_v21 = vpop.f32.mrf.mxu1  ;;  %4296 = vmatmul.mubr.msk.f32.gmra.mxu1 %vm384_vm2, %v6296_v9  ;;  %4348 = vmatprep.mubr.msk.f32.mxu0 %vm384_vm2, %v4907_v49 }
  0xfc   : > { %v5508_v43 = vadd.f32 %v1186_v29, %v812_v27  ;;  %v827_v10 = vadd.f32 %v3997_v21, %v5363_v61  ;;  %v1196_v17 = vpop.f32.mrf.mxu0  ;;  %4298 = vmatprep.mubr.msk.f32.mxu1 %vm384_vm2, %v6337_v23 }
  0xfd   : > { %v821_v5 = vpop.f32.mrf.mxu1 }
  0xfe   : > { %v5513_v20 = vadd.f32 %v4047_v16, %v827_v10  ;;  %v822_v60 = vadd.f32 %v821_v5, %v5373_v53  ;;  %v4050_v0 = vpop.f32.mrf.mxu0  ;;  %4349 = vmatmul.mubr.msk.f32.gmra.mxu0 %vm384_vm2, %v6316_v33  ;;  %v6338_v16 = vld [vmem:[#allocation21_spill] sm:$0xff]  ;;  %v6340_v10 = vld [vmem:[#allocation26_spill] sm:$0xff] }
  0xff   : > { %v4000_v9 = vpop.f32.mrf.mxu1  ;;  %4299 = vmatmul.mubr.msk.f32.gmra.mxu1 %vm384_vm2, %v6298_v46  ;;  %4351 = vmatprep.mubr.msk.f32.mxu0 %vm384_vm2, %v4924_v12 }
 0x100   : > { %v5522_v49 = vadd.f32 %v1196_v17, %v822_v60  ;;  %v837_v61 = vadd.f32 %v4000_v9, %v5379_v1  ;;  %v1206_v29 = vpop.f32.mrf.mxu0  ;;  %4301 = vmatprep.mubr.msk.f32.mxu1 %vm384_vm2, %v6338_v16  ;;  %v6341_v60 = vld [vmem:[#allocation28_spill] sm:$0xff]  ;;  %v6342_v9 = vld [vmem:[#allocation30_spill] sm:$0xff] }
 0x101   : > { %v831_v53 = vpop.f32.mrf.mxu1 }
 0x102   : > { %v5527_v27 = vadd.f32 %v4050_v0, %v837_v61  ;;  %v832_v33 = vadd.f32 %v831_v53, %v5389_v2  ;;  %v4053_v4 = vpop.f32.mrf.mxu0  ;;  %4352 = vmatmul.mubr.msk.f32.gmra.mxu0 %vm384_vm2, %v6317_v34  ;;  %v6343_v53 = vld [vmem:[#allocation32_spill] sm:$0xff] }
 0x103   : > { %v4003_v46 = vpop.f32.mrf.mxu1  ;;  %4302 = vmatmul.mubr.msk.f32.gmra.mxu1 %vm384_vm2, %v6339_v14  ;;  %4354 = vmatprep.mubr.msk.f32.mxu0 %vm384_vm2, %v4941_v37 }
 0x104   : > { %v5536_v12 = vadd.f32 %v1206_v29, %v832_v33  ;;  %v847_v1 = vadd.f32 %v4003_v46, %v5395_v44  ;;  %v1216_v21 = vpop.f32.mrf.mxu0  ;;  %4304 = vmatprep.mubr.msk.f32.mxu1 %vm384_vm2, %v6340_v10 }
 0x105   : > { %v841_v2 = vpop.f32.mrf.mxu1 }
 0x106   : > { %v5541_v17 = vadd.f32 %v4053_v4, %v847_v1  ;;  %v842_v34 = vadd.f32 %v841_v2, %v5405_v31  ;;  %v4056_v23 = vpop.f32.mrf.mxu0  ;;  %4355 = vmatmul.mubr.msk.f32.gmra.mxu0 %vm384_vm2, %v6318_v47  ;;  %v6344_v4 = vld [vmem:[#allocation2_spill] sm:$0xff]  ;;  %v6346_v2 = vld [vmem:[#allocation5_spill] sm:$0xff] }
 0x107   : > { %v4006_v5 = vpop.f32.mrf.mxu1  ;;  %4305 = vmatmul.mubr.msk.f32.gmra.mxu1 %vm384_vm2, %v6341_v60  ;;  %4357 = vmatprep.mubr.msk.f32.mxu0 %vm384_vm2, %v4958_v28  ;;  %v6347_v60 = vld [vmem:[#allocation7_spill] sm:$0xff] }
 0x108   : > { %v5550_v37 = vadd.f32 %v1216_v21, %v842_v34  ;;  %v857_v44 = vadd.f32 %v4006_v5, %v5411_v3  ;;  %v1226_v0 = vpop.f32.mrf.mxu0  ;;  %4307 = vmatprep.mubr.msk.f32.mxu1 %vm384_vm2, %v6342_v9  ;;  %v6345_v21 = vld [vmem:[#allocation3_spill] sm:$0xff] }
 0x109   : > { %v851_v31 = vpop.f32.mrf.mxu1 }
 0x10a   : > { %v5555_v61 = vadd.f32 %v4056_v23, %v857_v44  ;;  %v852_v47 = vadd.f32 %v851_v31, %v5421_v11  ;;  %v4059_v29 = vpop.f32.mrf.mxu0  ;;  %4358 = vmatmul.mubr.msk.f32.gmra.mxu0 %vm384_vm2, %v6319_v48 }
 0x10b   : > { %v4009_v16 = vpop.f32.mrf.mxu1  ;;  %4308 = vmatmul.mubr.msk.f32.gmra.mxu1 %vm384_vm2, %v6343_v53  ;;  %4360 = vmatprep.mubr.msk.f32.mxu0 %vm384_vm2, %v4975_v45  ;;  %v6350_v53 = vld [vmem:[#allocation13_spill] sm:$0xff] }
 0x10c   : > { %v5564_v28 = vadd.f32 %v1226_v0, %v852_v47  ;;  %v867_v3 = vadd.f32 %v4009_v16, %v5429_v62  ;;  %v1236_v33 = vpop.f32.mrf.mxu0  ;;  %4310 = vmatprep.mubr.msk.f32.mxu1 %vm384_vm2, %v6344_v4  ;;  %v6348_v0 = vld [vmem:[#allocation9_spill] sm:$0xff] }
 0x10d   : > { %v861_v11 = vpop.f32.mrf.mxu1 }
 0x10e   : > { %v5569_v46 = vadd.f32 %v4059_v29, %v867_v3  ;;  %v862_v48 = vadd.f32 %v861_v11, %v5439_v51  ;;  %v4062_v14 = vpop.f32.mrf.mxu0  ;;  %4361 = vmatmul.mubr.msk.f32.gmra.mxu0 %vm384_vm2, %v6320_v55  ;;  %v6349_v29 = vld [vmem:[#allocation11_spill] sm:$0xff] }
 0x10f   : > { %v4012_v1 = vpop.f32.mrf.mxu1  ;;  %4311 = vmatmul.mubr.msk.f32.gmra.mxu1 %vm384_vm2, %v6345_v21  ;;  %4363 = vmatprep.mubr.msk.f32.mxu0 %vm384_vm2, %v4992_v26  ;;  %v6351_v11 = vld [vmem:[#allocation15_spill] sm:$0xff] }
 0x110   : > { %v5578_v62 = vadd.f32 %v1236_v33, %v862_v48  ;;  %v877_v45 = vadd.f32 %v4012_v1, %v5452_v50  ;;  %v1246_v10 = vpop.f32.mrf.mxu0  ;;  %4313 = vmatprep.mubr.msk.f32.mxu1 %vm384_vm2, %v6346_v2 }
 0x111   : > { %v871_v51 = vpop.f32.mrf.mxu1 }
 0x112   : > { %v5583_v34 = vadd.f32 %v4062_v14, %v877_v45  ;;  %v872_v55 = vadd.f32 %v871_v51, %v5465_v52  ;;  %v4065_v23 = vpop.f32.mrf.mxu0  ;;  %4364 = vmatmul.mubr.msk.f32.gmra.mxu0 %vm384_vm2, %v6321_v19  ;;  %v6352_v14 = vld [vmem:[#allocation17_spill] sm:$0xff]  ;;  %v6354_v51 = vld [vmem:[#allocation22_spill] sm:$0xff] }
 0x113   : > { %v4015_v5 = vpop.f32.mrf.mxu1  ;;  %4314 = vmatmul.mubr.msk.f32.gmra.mxu1 %vm384_vm2, %v6347_v60  ;;  %4366 = vmatprep.mubr.msk.f32.mxu0 %vm384_vm2, %v5009_v42  ;;  %v6355_v60 = vld [vmem:[#allocation25_spill] sm:$0xff] }
 0x114   : > { %v5592_v26 = vadd.f32 %v1246_v10, %v872_v55  ;;  %v887_v50 = vadd.f32 %v4015_v5, %v5474_v41  ;;  %v1256_v44 = vpop.f32.mrf.mxu0  ;;  %4316 = vmatprep.mubr.msk.f32.mxu1 %vm384_vm2, %v6348_v0  ;;  %v6353_v10 = vld [vmem:[#allocation20_spill] sm:$0xff] }
 0x115   : > { %v881_v52 = vpop.f32.mrf.mxu1 }
 0x116   : > { %v5597_v9 = vadd.f32 %v4065_v23, %v887_v50  ;;  %v882_v19 = vadd.f32 %v881_v52, %v5484_v15  ;;  %v4068_v31 = vpop.f32.mrf.mxu0  ;;  %4367 = vmatmul.mubr.msk.f32.gmra.mxu0 %vm384_vm2, %v6322_v25 }
 0x117   : > { %v4018_v47 = vpop.f32.mrf.mxu1  ;;  %4317 = vmatmul.mubr.msk.f32.gmra.mxu1 %vm384_vm2, %v6349_v29  ;;  %4369 = vmatprep.mubr.msk.f32.mxu0 %vm384_vm2, %v6323_v30  ;;  %v6358_v29 = vld [vmem:[#allocation6_spill] sm:$0xff] }
 0x118   : > { %v5606_v42 = vadd.f32 %v1256_v44, %v882_v19  ;;  %v897_v41 = vadd.f32 %v4018_v47, %v5351_v8  ;;  %v1266_v16 = vpop.f32.mrf.mxu0  ;;  %4319 = vmatprep.mubr.msk.f32.mxu1 %vm384_vm2, %v6350_v53  ;;  %v6356_v44 = vld [vmem:[#allocation27_spill] sm:$0xff]  ;;  %v2457_v53 = vrot.slane %v5444_v36, 1 }
 0x119   : > { %v891_v15 = vpop.f32.mrf.mxu1 }
 0x11a   : > { %v5611_v3 = vadd.f32 %v4068_v31, %v897_v41  ;;  %v892_v25 = vadd.f32 %v891_v15, %v5361_v35  ;;  %v4071_v33 = vpop.f32.mrf.mxu0  ;;  %4370 = vmatmul.mubr.msk.f32.gmra.mxu0 %vm384_vm2, %v6324_v24  ;;  %v2729_v31 = vrot.slane %v5463_v32, 2  ;;  %v2458_v15 = vrot.slane %v5463_v32, 1  ;;  %v6364_v32 = vld [vmem:[#allocation10_spill] sm:$0xff] }
 0x11b   : > { %v4021_v4 = vpop.f32.mrf.mxu1  ;;  %4320 = vmatmul.mubr.msk.f32.gmra.mxu1 %vm384_vm2, %v6351_v11  ;;  %4372 = vmatprep.mubr.msk.f32.mxu0 %vm384_vm2, %v6325_v40 }
 0x11c   : > { %v5620_v8 = vadd.f32 %v1266_v16, %v892_v25  ;;  %v907_v30 = vadd.f32 %v4021_v4, %v5367_v39  ;;  %v1276_v48 = vpop.f32.mrf.mxu0  ;;  %4322 = vmatprep.mubr.msk.f32.mxu1 %vm384_vm2, %v6352_v14  ;;  %v6359_v16 = vld [vmem:[#allocation31_spill] sm:$0xff]  ;;  %v6362_v14 = vld [vmem:[#allocation33_spill] sm:$0xff] }
 0x11d   : > { %v901_v35 = vpop.f32.mrf.mxu1 }
 0x11e   : > { %v5625_v1 = vadd.f32 %v4071_v33, %v907_v30  ;;  %v902_v24 = vadd.f32 %v901_v35, %v5377_v59  ;;  %v4074_v21 = vpop.f32.mrf.mxu0  ;;  %4373 = vmatmul.mubr.msk.f32.gmra.mxu0 %vm384_vm2, %v6326_v22  ;;  %v6361_v30 = vld [vmem:[#allocation18_spill] sm:$0xff] }
 0x11f   : > { %v4024_v45 = vpop.f32.mrf.mxu1  ;;  %4323 = vmatmul.mubr.msk.f32.gmra.mxu1 %vm384_vm2, %v6353_v10  ;;  %4375 = vmatprep.mubr.msk.f32.mxu0 %vm384_vm2, %v5060_v38  ;;  %v6363_v35 = vld [vmem:[#allocation14_spill] sm:$0xff]  ;;  %v6365_v10 = vld [vmem:[#allocation23_spill] sm:$0xff] }
 0x120   : > { %v5634_v39 = vadd.f32 %v1276_v48, %v902_v24  ;;  %v917_v40 = vadd.f32 %v4024_v45, %v5383_v54  ;;  %v1286_v2 = vpop.f32.mrf.mxu0  ;;  %4325 = vmatprep.mubr.msk.f32.mxu1 %vm384_vm2, %v6354_v51 }
 0x121   : > { %v911_v59 = vpop.f32.mrf.mxu1 }
 0x122   : > { %v5639_v55 = vadd.f32 %v4074_v21, %v917_v40  ;;  %v912_v22 = vadd.f32 %v911_v59, %v5393_v7  ;;  %v4077_v23 = vpop.f32.mrf.mxu0  ;;  %4376 = vmatmul.mubr.msk.f32.gmra.mxu0 %vm384_vm2, %v5071_v58  ;;  %v2459_v59 = vsel %vm301_vm1, %v2457_v53, %v2458_v15 }
 0x123   : > { %v4027_v5 = vpop.f32.mrf.mxu1  ;;  %4326 = vmatmul.mubr.msk.f32.gmra.mxu1 %vm384_vm2, %v6355_v60  ;;  %4378 = vmatprep.mubr.msk.f32.mxu0 %vm384_vm2, %v5077_v56  ;;  %v6357_v56 = vld [vmem:[#allocation29_spill] sm:$0xff] }
 0x124   : > { %v5648_v38 = vadd.f32 %v1286_v2, %v912_v22  ;;  %v927_v54 = vadd.f32 %v4027_v5, %v5399_v6  ;;  %v1296_v50 = vpop.f32.mrf.mxu0  ;;  %4328 = vmatprep.mubr.msk.f32.mxu1 %vm384_vm2, %v6356_v44  ;;  %v2728_v6 = vrot.slane %v5444_v36, 2  ;;  %v6368_v44 = vld [vmem:[#allocation4_spill] sm:$0xff] }
 0x125   : > { %v921_v7 = vpop.f32.mrf.mxu1 }
 0x126   : > { %v5653_v0 = vadd.f32 %v4077_v23, %v927_v54  ;;  %v922_v58 = vadd.f32 %v921_v7, %v5409_v18  ;;  %v4080_v52 = vpop.f32.mrf.mxu0  ;;  %4379 = vmatmul.mubr.msk.f32.gmra.mxu0 %vm384_vm2, %v5088_v63  ;;  %v251_v63 = vld [vmem:[%s4463_s26 + $0x1a8] sm:$0x3]  ;;  %v2730_v40 = vsel %vm970_vm3, %v2728_v6, %v2729_v31  ;;  %v6366_v23 = vld [vmem:[#allocation12_spill] sm:$0xff]  ;;  %v6367_v54 = vld [vmem:[#allocation34_spill] sm:$0xff] }
 0x127   : > { %v4030_v19 = vpop.f32.mrf.mxu1  ;;  %4329 = vmatmul.mubr.msk.f32.gmra.mxu1 %vm384_vm2, %v6357_v56  ;;  %4381 = vmatprep.mubr.msk.f32.mxu0 %vm384_vm2, %v5094_v13  ;;  %v6360_v13 = vld [vmem:[#allocation8_spill] sm:$0xff]  ;;  %v2731_v24 = vrot.slane %v251_v63, 2  ;;  %v2460_v2 = vrot.slane %v251_v63, 1 }
 0x128   : > { %v5664_v47 = vadd.f32 %v1296_v50, %v922_v58  ;;  %v937_v41 = vadd.f32 %v4030_v19, %v6358_v29  ;;  %v1306_v18 = vpop.f32.mrf.mxu0  ;;  %4331 = vmatprep.mubr.msk.f32.mxu1 %vm384_vm2, %v6359_v16 }
 0x129   : > { %v931_v25 = vpop.f32.mrf.mxu1  ;;  %v2732_v7 = vsel %vm970_vm3, %v2729_v31, %v2731_v24  ;;  %v2461_v6 = vsel %vm301_vm1, %v2458_v15, %v2460_v2  ;;  %v6372_v15 = vld [vmem:[#allocation37_spill] sm:$0xff] }
 0x12a   : > { %v5672_v33 = vadd.f32 %v4080_v52, %v937_v41  ;;  %v932_v4 = vadd.f32 %v931_v25, %v6360_v13  ;;  %v4083_v11 = vpop.f32.mrf.mxu0  ;;  %4382 = vmatmul.mubr.msk.f32.gmra.mxu0 %vm384_vm2, %v6361_v30  ;;  %v6369_v52 = vld [vmem:[#allocation19_spill] sm:$0xff]  ;;  %v6371_v25 = vld [vmem:[#allocation36_spill] sm:$0xff] }
 0x12b   : > { %v4033_v48 = vpop.f32.mrf.mxu1  ;;  %4332 = vmatmul.mubr.msk.f32.gmra.mxu1 %vm384_vm2, %v6362_v14  ;;  %4384 = vmatprep.mubr.msk.f32.mxu0 %vm384_vm2, %v6363_v35 }
 0x12c   : > { %v5681_v36 = vadd.f32 %v1306_v18, %v932_v4  ;;  %v947_v21 = vadd.f32 %v4033_v48, %v6364_v32  ;;  %v1316_v45 = vpop.f32.mrf.mxu0  ;;  %4334 = vmatprep.mubr.msk.f32.mxu1 %vm384_vm2, %v6365_v10  ;;  %v6370_v18 = vld [vmem:[#allocation35_spill] sm:$0xff] }
 0x12d   : > { %v941_v51 = vpop.f32.mrf.mxu1 }
 0x12e   : > { %v5688_v22 = vadd.f32 %v4083_v11, %v947_v21  ;;  %v942_v5 = vadd.f32 %v941_v51, %v6366_v23  ;;  %v4086_v60 = vpop.f32.mrf.mxu0  ;;  %4385 = vmatmul.mubr.msk.f32.gmra.mxu0 %vm384_vm2, %v6367_v54 }
 0x12f   : > { %v4036_v50 = vpop.f32.mrf.mxu1  ;;  %4335 = vmatmul.mubr.msk.f32.gmra.mxu1 %vm384_vm2, %v6368_v44  ;;  %4387 = vmatprep.mubr.msk.f32.mxu0 %vm384_vm2, %v2730_v40 }
 0x130   : > { %v5697_v58 = vadd.f32 %v1316_v45, %v942_v5  ;;  %v957_v19 = vadd.f32 %v4036_v50, %v6369_v52  ;;  %v1326_v56 = vpop.f32.mrf.mxu0  ;;  %4337 = vmatprep.mubr.msk.f32.mxu1 %vm384_vm2, %v2459_v59 }
 0x131   : > { %v951_v29 = vpop.f32.mrf.mxu1 }
 0x132   : > { %v5702_v41 = vadd.f32 %v4086_v60, %v957_v19  ;;  %v952_v16 = vadd.f32 %v951_v29, %v6370_v18  ;;  %v4089_v63 = vpop.f32.mrf.mxu0  ;;  %4388 = vmatmul.mubr.msk.f32.gmra.mxu0 %vm384_vm2, %v2732_v7 }
 0x133   : > { %v4039_v53 = vpop.f32.mrf.mxu1  ;;  %4338 = vmatmul.mubr.msk.f32.gmra.mxu1 %vm384_vm2, %v2461_v6 }
 0x134   : > { %v5707_v31 = vadd.f32 %v1326_v56, %v952_v16  ;;  %v967_v13 = vadd.f32 %v4039_v53, %v6371_v25  ;;  %v1336_v4 = vpop.f32.mrf.mxu0 }
 0x135   : > { %v961_v11 = vpop.f32.mrf.mxu1 }
 0x136   : > { %v5710_v30 = vadd.f32 %v4089_v63, %v967_v13  ;;  %v962_v48 = vadd.f32 %v961_v11, %v6372_v15  ;;  %v4144_v14 = vpop.f32.mrf.mxu0 }
 0x137   : > { %v4094_v35 = vpop.f32.mrf.mxu1 }
 0x138   : > { %v5713_v24 = vadd.f32 %v1336_v4, %v962_v48  ;;  %v1614_v32 = vadd.f32 %v4094_v35, %v5499_v57  ;;  %v1726_v21 = vpop.f32.mrf.mxu0 }
 0x139   : > { %v1454_v45 = vpop.f32.mrf.mxu1 }
 0x13a   : > { %v5716_v10 = vadd.f32 %v4144_v14, %v1614_v32  ;;  %v1613_v40 = vadd.f32 %v1454_v45, %v5508_v43  ;;  %v4147_v2 = vpop.f32.mrf.mxu0 }
 0x13b   : > { %v4097_v51 = vpop.f32.mrf.mxu1 }
 0x13c   : > { %v5719_v59 = vadd.f32 %v1726_v21, %v1613_v40  ;;  %v1616_v23 = vadd.f32 %v4097_v51, %v5513_v20  ;;  %v1736_v5 = vpop.f32.mrf.mxu0 }
 0x13d   : > { %v1464_v60 = vpop.f32.mrf.mxu1 }
 0x13e   : > { %v5722_v54 = vadd.f32 %v4147_v2, %v1616_v23  ;;  %v1615_v50 = vadd.f32 %v1464_v60, %v5522_v49  ;;  %v4150_v44 = vpop.f32.mrf.mxu0 }
 0x13f   : > { %v4100_v57 = vpop.f32.mrf.mxu1 }
 0x140   : > { %v5725_v7 = vadd.f32 %v1736_v5, %v1615_v50  ;;  %v1618_v52 = vadd.f32 %v4100_v57, %v5527_v27  ;;  %v1746_v19 = vpop.f32.mrf.mxu0 }
 0x141   : > { %v1474_v43 = vpop.f32.mrf.mxu1 }
 0x142   : > { %v5728_v56 = vadd.f32 %v4150_v44, %v1618_v52  ;;  %v1617_v6 = vadd.f32 %v1474_v43, %v5536_v12  ;;  %v4153_v29 = vpop.f32.mrf.mxu0 }
 0x143   : > { %v4103_v20 = vpop.f32.mrf.mxu1 }
 0x144   : > { %v5731_v18 = vadd.f32 %v1746_v19, %v1617_v6  ;;  %v1620_v16 = vadd.f32 %v4103_v20, %v5541_v17  ;;  %v1756_v63 = vpop.f32.mrf.mxu0 }
 0x145   : > { %v1484_v49 = vpop.f32.mrf.mxu1 }
 0x146   : > { %v5734_v53 = vadd.f32 %v4153_v29, %v1620_v16  ;;  %v1619_v25 = vadd.f32 %v1484_v49, %v5550_v37  ;;  %v4156_v13 = vpop.f32.mrf.mxu0 }
 0x147   : > { %v4106_v27 = vpop.f32.mrf.mxu1 }
 0x148   : > { %v5737_v4 = vadd.f32 %v1756_v63, %v1619_v25  ;;  %v1622_v11 = vadd.f32 %v4106_v27, %v5555_v61  ;;  %v1766_v15 = vpop.f32.mrf.mxu0 }
 0x149   : > { %v1494_v12 = vpop.f32.mrf.mxu1 }
 0x14a   : > { %v5740_v48 = vadd.f32 %v4156_v13, %v1622_v11  ;;  %v1621_v14 = vadd.f32 %v1494_v12, %v5564_v28  ;;  %v4159_v35 = vpop.f32.mrf.mxu0 }
 0x14b   : > { %v4109_v17 = vpop.f32.mrf.mxu1 }
 0x14c   : > { %v5743_v32 = vadd.f32 %v1766_v15, %v1621_v14  ;;  %v1624_v21 = vadd.f32 %v4109_v17, %v5569_v46  ;;  %v1776_v45 = vpop.f32.mrf.mxu0 }
 0x14d   : > { %v1504_v37 = vpop.f32.mrf.mxu1 }
 0x14e   : > { %v5746_v40 = vadd.f32 %v4159_v35, %v1624_v21  ;;  %v1623_v2 = vadd.f32 %v1504_v37, %v5578_v62  ;;  %v4162_v51 = vpop.f32.mrf.mxu0 }
 0x14f   : > { %v4112_v61 = vpop.f32.mrf.mxu1 }
 0x150   : > { %v5749_v23 = vadd.f32 %v1776_v45, %v1623_v2  ;;  %v1626_v5 = vadd.f32 %v4112_v61, %v5583_v34  ;;  %v1786_v60 = vpop.f32.mrf.mxu0 }
 0x151   : > { %v1514_v28 = vpop.f32.mrf.mxu1 }
 0x152   : > { %v5752_v50 = vadd.f32 %v4162_v51, %v1626_v5  ;;  %v1625_v44 = vadd.f32 %v1514_v28, %v5592_v26  ;;  %v4165_v57 = vpop.f32.mrf.mxu0 }
 0x153   : > { %v4115_v46 = vpop.f32.mrf.mxu1 }
 0x154   : > { %6373 = vst [vmem:[#allocation38_spill] sm:$0xff] %v5752_v50  ;;  %v5755_v52 = vadd.f32 %v1786_v60, %v1625_v44  ;;  %v1628_v19 = vadd.f32 %v4115_v46, %v5597_v9  ;;  %v1796_v43 = vpop.f32.mrf.mxu0 }
 0x155   : > { %v1524_v62 = vpop.f32.mrf.mxu1 }
 0x156   : > { %6374 = vst [vmem:[#allocation39_spill] sm:$0xff] %v5755_v52  ;;  %v5758_v6 = vadd.f32 %v4165_v57, %v1628_v19  ;;  %v1627_v29 = vadd.f32 %v1524_v62, %v5606_v42  ;;  %v4168_v20 = vpop.f32.mrf.mxu0 }
 0x157   : > { %v4118_v34 = vpop.f32.mrf.mxu1 }
 0x158   : > { %6375 = vst [vmem:[#allocation40_spill] sm:$0xff] %v5758_v6  ;;  %v5761_v16 = vadd.f32 %v1796_v43, %v1627_v29  ;;  %v1630_v63 = vadd.f32 %v4118_v34, %v5611_v3  ;;  %v1806_v49 = vpop.f32.mrf.mxu0 }
 0x159   : > { %v1534_v26 = vpop.f32.mrf.mxu1 }
 0x15a   : > { %6376 = vst [vmem:[#allocation41_spill] sm:$0xff] %v5761_v16  ;;  %v5764_v25 = vadd.f32 %v4168_v20, %v1630_v63  ;;  %v1629_v13 = vadd.f32 %v1534_v26, %v5620_v8  ;;  %v4171_v27 = vpop.f32.mrf.mxu0 }
 0x15b   : > { %v4121_v9 = vpop.f32.mrf.mxu1 }
 0x15c   : > { %v5767_v11 = vadd.f32 %v1806_v49, %v1629_v13  ;;  %v1632_v15 = vadd.f32 %v4121_v9, %v5625_v1  ;;  %v1816_v12 = vpop.f32.mrf.mxu0 }
 0x15d   : > { %v1544_v42 = vpop.f32.mrf.mxu1 }
 0x15e   : > { %v5770_v14 = vadd.f32 %v4171_v27, %v1632_v15  ;;  %v1631_v35 = vadd.f32 %v1544_v42, %v5634_v39  ;;  %v4174_v17 = vpop.f32.mrf.mxu0 }
 0x15f   : > { %v4124_v3 = vpop.f32.mrf.mxu1 }
 0x160   : > { %v5773_v21 = vadd.f32 %v1816_v12, %v1631_v35  ;;  %v1634_v45 = vadd.f32 %v4124_v3, %v5639_v55  ;;  %v1826_v37 = vpop.f32.mrf.mxu0 }
 0x161   : > { %v1554_v8 = vpop.f32.mrf.mxu1 }
 0x162   : > { %v5776_v2 = vadd.f32 %v4174_v17, %v1634_v45  ;;  %v1633_v51 = vadd.f32 %v1554_v8, %v5648_v38  ;;  %v4177_v61 = vpop.f32.mrf.mxu0 }
 0x163   : > { %v4127_v1 = vpop.f32.mrf.mxu1 }
 0x164   : > { %v5779_v5 = vadd.f32 %v1826_v37, %v1633_v51  ;;  %v1636_v60 = vadd.f32 %v4127_v1, %v5653_v0  ;;  %v1836_v28 = vpop.f32.mrf.mxu0 }
 0x165   : > { %v1564_v39 = vpop.f32.mrf.mxu1 }
 0x166   : > { %v5782_v44 = vadd.f32 %v4177_v61, %v1636_v60  ;;  %v1635_v57 = vadd.f32 %v1564_v39, %v5664_v47  ;;  %v4180_v46 = vpop.f32.mrf.mxu0 }
 0x167   : > { %v4130_v55 = vpop.f32.mrf.mxu1 }
 0x168   : > { %v5785_v19 = vadd.f32 %v1836_v28, %v1635_v57  ;;  %v1638_v43 = vadd.f32 %v4130_v55, %v5672_v33  ;;  %v1846_v62 = vpop.f32.mrf.mxu0 }
 0x169   : > { %v1574_v38 = vpop.f32.mrf.mxu1 }
 0x16a   : > { %v5788_v29 = vadd.f32 %v4180_v46, %v1638_v43  ;;  %v1637_v20 = vadd.f32 %v1574_v38, %v5681_v36  ;;  %v4183_v34 = vpop.f32.mrf.mxu0 }
 0x16b   : > { %v4133_v0 = vpop.f32.mrf.mxu1 }
 0x16c   : > { %v5791_v63 = vadd.f32 %v1846_v62, %v1637_v20  ;;  %v1640_v49 = vadd.f32 %v4133_v0, %v5688_v22  ;;  %v1856_v26 = vpop.f32.mrf.mxu0 }
 0x16d   : > { %v1584_v47 = vpop.f32.mrf.mxu1 }
 0x16e   : > { %v5794_v13 = vadd.f32 %v4183_v34, %v1640_v49  ;;  %v1639_v27 = vadd.f32 %v1584_v47, %v5697_v58  ;;  %v4186_v9 = vpop.f32.mrf.mxu0 }
 0x16f   : > { %v4136_v33 = vpop.f32.mrf.mxu1 }
 0x170   : > { %v5797_v15 = vadd.f32 %v1856_v26, %v1639_v27  ;;  %v1642_v12 = vadd.f32 %v4136_v33, %v5702_v41  ;;  %v1866_v42 = vpop.f32.mrf.mxu0 }
 0x171   : > { %v1594_v36 = vpop.f32.mrf.mxu1 }
 0x172   : > { %v5800_v35 = vadd.f32 %v4186_v9, %v1642_v12  ;;  %v1641_v17 = vadd.f32 %v1594_v36, %v5707_v31  ;;  %v4189_v3 = vpop.f32.mrf.mxu0 }
 0x173   : > { %v4139_v22 = vpop.f32.mrf.mxu1 }
 0x174   : > { %v5803_v45 = vadd.f32 %v1866_v42, %v1641_v17  ;;  %v1644_v37 = vadd.f32 %v4139_v22, %v5710_v30  ;;  %v1876_v8 = vpop.f32.mrf.mxu0 }
 0x175   : > { %v1604_v58 = vpop.f32.mrf.mxu1 }
 0x176   : > { %v5806_v51 = vadd.f32 %v4189_v3, %v1644_v37  ;;  %v1643_v61 = vadd.f32 %v1604_v58, %v5713_v24  ;;  %v5809_v1 = vpop.f32.mrf.mxu0 }
 0x177   : > { %v5811_v41 = vpop.f32.mrf.mxu1 }
 0x178   : > { %v5813_v60 = vadd.f32 %v1876_v8, %v1643_v61  ;;  %v5815_v28 = vpop.f32.mrf.mxu0 }
 0x179   : > { %v5817_v31 = vpop.f32.mrf.mxu1 }
 0x17a   : > { %v5819_v39 = vpop.f32.mrf.mxu0 }
 0x17b   : > { %v5821_v57 = vpop.f32.mrf.mxu1 }
 0x17c   : > { %v5823_v30 = vpop.f32.mrf.mxu0 }
 0x17d   : > { %v5825_v46 = vpop.f32.mrf.mxu1 }
 0x17e   : > { %v5827_v55 = vpop.f32.mrf.mxu0 }
 0x17f   : > { %v5829_v24 = vpop.f32.mrf.mxu1 }
 0x180   : > { %v5831_v43 = vpop.f32.mrf.mxu0 }
 0x181   : > { %v5833_v62 = vpop.f32.mrf.mxu1 }
 0x182   : > { %v5835_v38 = vpop.f32.mrf.mxu0 }
 0x183   : > { %v5837_v20 = vpop.f32.mrf.mxu1 }
 0x184   : > { %v5839_v34 = vpop.f32.mrf.mxu0 }
 0x185   : > { %v5841_v0 = vpop.f32.mrf.mxu1 }
 0x186   : > { %v5843_v49 = vpop.f32.mrf.mxu0 }
 0x187   : > { %v5845_v26 = vpop.f32.mrf.mxu1 }
 0x188   : > { %v5847_v47 = vpop.f32.mrf.mxu0 }
 0x189   : > { %6377 = vst [vmem:[#allocation42_spill] sm:$0xff] %v5847_v47  ;;  %v5849_v27 = vpop.f32.mrf.mxu1 }
 0x18a   : > { %v5851_v9 = vpop.f32.mrf.mxu0 }
 0x18b   : > { %6378 = vst [vmem:[#allocation43_spill] sm:$0xff] %v5851_v9  ;;  %v5853_v33 = vpop.f32.mrf.mxu1 }
 0x18c   : > { %v5855_v12 = vpop.f32.mrf.mxu0 }
 0x18d   : > { %6379 = vst [vmem:[#allocation44_spill] sm:$0xff] %v5855_v12  ;;  %v5857_v42 = vpop.f32.mrf.mxu1 }
 0x18e   : > { %6380 = vst [vmem:[#allocation16_spill] sm:$0xff] %v5857_v42  ;;  %v5859_v36 = vpop.f32.mrf.mxu0 }
 0x18f   : > { %6381 = vst [vmem:[#allocation21_spill] sm:$0xff] %v5859_v36  ;;  %v5861_v17 = vpop.f32.mrf.mxu1 }
 0x190   : > { %6382 = vst [vmem:[#allocation24_spill] sm:$0xff] %v5861_v17  ;;  %v5863_v3 = vpop.f32.mrf.mxu0 }
 0x191   : > { %6383 = vst [vmem:[#allocation26_spill] sm:$0xff] %v5863_v3  ;;  %v5865_v22 = vpop.f32.mrf.mxu1 }
 0x192   : > { %6384 = vst [vmem:[#allocation28_spill] sm:$0xff] %v5865_v22  ;;  %v5867_v37 = vpop.f32.mrf.mxu0 }
 0x193   : > { %6385 = vst [vmem:[#allocation30_spill] sm:$0xff] %v5867_v37  ;;  %v5869_v8 = vpop.f32.mrf.mxu1 }
 0x194   : > { %6386 = vst [vmem:[#allocation32_spill] sm:$0xff] %v5869_v8  ;;  %v5871_v58 = vpop.f32.mrf.mxu0 }
 0x195   : > { %6387 = vst [vmem:[#allocation2_spill] sm:$0xff] %v5871_v58  ;;  %v5873_v61 = vpop.f32.mrf.mxu1 }
 0x196   : > { %6388 = vst [vmem:[#allocation3_spill] sm:$0xff] %v5873_v61  ;;  %v4268_v16 = vpop.f32.mrf.mxu0 }
 0x197   : > { %v4218_v12 = vpop.f32.mrf.mxu1 }
 0x198   : > { %v2173_v6 = vadd.f32 %v4218_v12, %v5764_v25  ;;  %v2345_v52 = vpop.f32.mrf.mxu0 }
 0x199   : > { %v2077_v36 = vpop.f32.mrf.mxu1 }
 0x19a   : > { %v5876_v9 = vadd.f32 %v4268_v16, %v2173_v6  ;;  %v2172_v3 = vadd.f32 %v2077_v36, %v5767_v11  ;;  %v4271_v47 = vpop.f32.mrf.mxu0 }
 0x19b   : > { %v4221_v22 = vpop.f32.mrf.mxu1 }
 0x19c   : > { %v5879_v17 = vadd.f32 %v2345_v52, %v2172_v3  ;;  %v2175_v37 = vadd.f32 %v4221_v22, %v5770_v14  ;;  %v2355_v8 = vpop.f32.mrf.mxu0 }
 0x19d   : > { %v2087_v58 = vpop.f32.mrf.mxu1 }
 0x19e   : > { %v5882_v50 = vadd.f32 %v4271_v47, %v2175_v37  ;;  %v2174_v61 = vadd.f32 %v2087_v58, %v5773_v21  ;;  %v4274_v42 = vpop.f32.mrf.mxu0 }
 0x19f   : > { %v4224_v25 = vpop.f32.mrf.mxu1 }
 0x1a0   : > { %v5885_v12 = vadd.f32 %v2355_v8, %v2174_v61  ;;  %v2177_v6 = vadd.f32 %v4224_v25, %v5776_v2  ;;  %v2365_v16 = vpop.f32.mrf.mxu0 }
 0x1a1   : > { %v2097_v11 = vpop.f32.mrf.mxu1 }
 0x1a2   : > { %v5888_v36 = vadd.f32 %v4274_v42, %v2177_v6  ;;  %v2176_v52 = vadd.f32 %v2097_v11, %v5779_v5  ;;  %v4277_v3 = vpop.f32.mrf.mxu0 }
 0x1a3   : > { %v4227_v14 = vpop.f32.mrf.mxu1 }
 0x1a4   : > { %v5891_v22 = vadd.f32 %v2365_v16, %v2176_v52  ;;  %v2179_v47 = vadd.f32 %v4227_v14, %v5782_v44  ;;  %v2375_v37 = vpop.f32.mrf.mxu0 }
 0x1a5   : > { %v2107_v21 = vpop.f32.mrf.mxu1 }
 0x1a6   : > { %v5894_v58 = vadd.f32 %v4277_v3, %v2179_v47  ;;  %v2178_v8 = vadd.f32 %v2107_v21, %v5785_v19  ;;  %v4280_v61 = vpop.f32.mrf.mxu0 }
 0x1a7   : > { %v4230_v2 = vpop.f32.mrf.mxu1 }
 0x1a8   : > { %v5897_v25 = vadd.f32 %v2375_v37, %v2178_v8  ;;  %v2181_v42 = vadd.f32 %v4230_v2, %v5788_v29  ;;  %v2385_v6 = vpop.f32.mrf.mxu0 }
 0x1a9   : > { %v2117_v5 = vpop.f32.mrf.mxu1 }
 0x1aa   : > { %v5900_v11 = vadd.f32 %v4280_v61, %v2181_v42  ;;  %v2180_v16 = vadd.f32 %v2117_v5, %v5791_v63  ;;  %v4283_v52 = vpop.f32.mrf.mxu0  ;;  %v2157_v63 = vadd.f32 %v5811_v41, %v5716_v10  ;;  %v2159_v10 = vadd.f32 %v5821_v57, %v5722_v54 }
 0x1ab   : > { %v4233_v44 = vpop.f32.mrf.mxu1  ;;  %v2158_v41 = vadd.f32 %v5825_v46, %v5725_v7  ;;  %v2163_v54 = vadd.f32 %v5837_v20, %v5734_v53 }
 0x1ac   : > { %v5903_v14 = vadd.f32 %v2385_v6, %v2180_v16  ;;  %v2183_v3 = vadd.f32 %v4233_v44, %v5794_v13  ;;  %v2395_v47 = vpop.f32.mrf.mxu0 }
 0x1ad   : > { %v2127_v19 = vpop.f32.mrf.mxu1  ;;  %v2426_v53 = vadd.f32 %v5823_v30, %v2158_v41  ;;  %v2431_v30 = vadd.f32 %v5835_v38, %v2163_v54  ;;  %v6394_v41 = vld [vmem:[#allocation39_spill] sm:$0xff] }
 0x1ae   : > { %v5906_v21 = vadd.f32 %v4283_v52, %v2183_v3  ;;  %v2182_v37 = vadd.f32 %v2127_v19, %v5797_v15  ;;  %v4286_v8 = vpop.f32.mrf.mxu0  ;;  %v2156_v15 = vadd.f32 %v5817_v31, %v5719_v59  ;;  %v2161_v59 = vadd.f32 %v5829_v24, %v5728_v56  ;;  %v5946_v56 = vld [vmem:[%s6160_s2] ss:$0 sm:$0xff] }
 0x1af   : > { %v4236_v29 = vpop.f32.mrf.mxu1 }
 0x1b0   : > { %v5909_v2 = vadd.f32 %v2395_v47, %v2182_v37  ;;  %v2185_v61 = vadd.f32 %v4236_v29, %v5800_v35  ;;  %v2405_v42 = vpop.f32.mrf.mxu0  ;;  %v2425_v35 = vadd.f32 %v5809_v1, %v2157_v63  ;;  %v2424_v1 = vadd.f32 %v5815_v28, %v2156_v15 }
 0x1b1   : > { %v2137_v6 = vpop.f32.mrf.mxu1  ;;  %v2165_v29 = vadd.f32 %v5845_v26, %v5740_v48  ;;  %v2427_v28 = vadd.f32 %v5819_v39, %v2159_v10  ;;  %v2164_v48 = vadd.f32 %v5849_v27, %v5743_v32  ;;  %v5959_v26 = vld [vmem:[%s6161_s3] ss:$0 sm:$0xff] }
 0x1b2   : > { %v5914_v5 = vadd.f32 %v4286_v8, %v2185_v61  ;;  %v2184_v13 = vadd.f32 %v2137_v6, %v5803_v45  ;;  %v4289_v16 = vpop.f32.mrf.mxu0  ;;  %v2429_v61 = vadd.f32 %v5827_v55, %v2161_v59  ;;  %v6397_v59 = vld [vmem:[#allocation32_spill] sm:$0xff] }
 0x1b3   : > { %v4239_v52 = vpop.f32.mrf.mxu1  ;;  %v5965_v32 = vadd.f32 %v5843_v49, %v2165_v29  ;;  %v6398_v29 = vld [vmem:[#allocation44_spill] sm:$0xff] }
 0x1b4   : > { %v5919_v44 = vadd.f32 %v2405_v42, %v2184_v13  ;;  %v2187_v3 = vadd.f32 %v4239_v52, %v5806_v51  ;;  %v2415_v47 = vpop.f32.mrf.mxu0  ;;  %v2160_v51 = vadd.f32 %v5833_v62, %v5731_v18  ;;  %v6391_v13 = vld [vmem:[#allocation24_spill] sm:$0xff] }
 0x1b5   : > { %v2147_v19 = vpop.f32.mrf.mxu1 }
 0x1b6   : > { %v5927_v45 = vadd.f32 %v4289_v16, %v2187_v3  ;;  %v2186_v37 = vadd.f32 %v2147_v19, %v5813_v60  ;;  %v4344_v8 = vpop.f32.mrf.mxu0  ;;  %v2162_v60 = vadd.f32 %v5841_v0, %v5737_v4  ;;  %v2428_v4 = vadd.f32 %v5831_v43, %v2160_v51  ;;  %v6392_v19 = vld [vmem:[#allocation42_spill] sm:$0xff] }
 0x1b7   : > { %v4294_v31 = vpop.f32.mrf.mxu1  ;;  %v2167_v0 = vadd.f32 %v5853_v33, %v5746_v40  ;;  %v6389_v40 = vld [vmem:[#allocation16_spill] sm:$0xff]  ;;  %v6390_v33 = vld [vmem:[#allocation38_spill] sm:$0xff]  ;;  %v5974_v10 = vadd.f32 %v6392_v19, %v2164_v48 }
 0x1b8   : > { %v5937_v57 = vadd.f32 %v2415_v47, %v2186_v37  ;;  %v2697_v7 = vadd.f32 %v4294_v31, %v2425_v35  ;;  %v2808_v46 = vpop.f32.mrf.mxu0  ;;  %v2430_v43 = vadd.f32 %v5839_v34, %v2162_v60  ;;  %v2166_v27 = vadd.f32 %v6389_v40, %v5749_v23  ;;  %v6393_v34 = vld [vmem:[#allocation43_spill] sm:$0xff]  ;;  %v6395_v37 = vld [vmem:[#allocation28_spill] sm:$0xff]  ;;  %v6402_v40 = vld [vmem:[#allocation26_spill] sm:$0xff] }
 0x1b9   : > { %v2537_v18 = vpop.f32.mrf.mxu1  ;;  %v2169_v16 = vadd.f32 %v6391_v13, %v6390_v33  ;;  %v5977_v49 = vadd.f32 %v6393_v34, %v2167_v0  ;;  %v2168_v23 = vadd.f32 %v6395_v37, %v6394_v41  ;;  %v6404_v41 = vld [vmem:[#allocation2_spill] sm:$0xff] }
 0x1ba   : > { %v2968_v24 = vadd.f32 %v4344_v8, %v2697_v7  ;;  %v2696_v62 = vadd.f32 %v2537_v18, %v2424_v1  ;;  %v4347_v20 = vpop.f32.mrf.mxu0  ;;  %v6396_v8 = vld [vmem:[#allocation40_spill] sm:$0xff]  ;;  %v5986_v18 = vadd.f32 %v6398_v29, %v2166_v27  ;;  %v6403_v27 = vld [vmem:[#allocation30_spill] sm:$0xff] }
 0x1bb   : > { %v4297_v39 = vpop.f32.mrf.mxu1  ;;  %v2171_v51 = vadd.f32 %v6397_v59, %v6396_v8  ;;  %v5996_v33 = vadd.f32 %v6402_v40, %v2168_v23 }
 0x1bc   : > { %v3007_v42 = vmul.f32 %v5946_v56, %v2968_v24  ;;  %v2967_v63 = vadd.f32 %v2808_v46, %v2696_v62  ;;  %v2699_v55 = vadd.f32 %v4297_v39, %v2427_v28  ;;  %v2818_v6 = vpop.f32.mrf.mxu0  ;;  %v6399_v28 = vld [vmem:[#allocation21_spill] sm:$0xff]  ;;  %v6401_v62 = vld [vmem:[#allocation3_spill] sm:$0xff] }
 0x1bd   : > { %v2547_v52 = vpop.f32.mrf.mxu1  ;;  %v6400_v24 = vld [vmem:[#allocation41_spill] sm:$0xff]  ;;  %v5999_v13 = vadd.f32 %v6403_v27, %v2171_v51 }
 0x1be   : > { %v3046_v15 = vadd.f32 %v5959_v26, %v3007_v42  ;;  %v3006_v38 = vmul.f32 %v5946_v56, %v2967_v63  ;;  %v2970_v3 = vadd.f32 %v4347_v20, %v2699_v55  ;;  %v2698_v47 = vadd.f32 %v2547_v52, %v2426_v53  ;;  %v4350_v35 = vpop.f32.mrf.mxu0 }
 0x1bf   : > { %v4300_v31 = vpop.f32.mrf.mxu1  ;;  %v5989_v53 = vadd.f32 %v6399_v28, %v2169_v16  ;;  %v2170_v20 = vadd.f32 %v6401_v62, %v6400_v24 }
 0x1c0   : > { %v3078_v1 = vadd.f32 3.0, %v3046_v15  ;;  %v3045_v54 = vadd.f32 %v5959_v26, %v3006_v38  ;;  %v3009_v7 = vmul.f32 %v5946_v56, %v2970_v3  ;;  %v2969_v46 = vadd.f32 %v2818_v6, %v2698_v47  ;;  %v2828_v60 = vpop.f32.mrf.mxu0 }
 0x1c1   : > { %v2701_v48 = vadd.f32 %v4300_v31, %v2429_v61  ;;  %v2557_v0 = vpop.f32.mrf.mxu1  ;;  %v6004_v37 = vadd.f32 %v6404_v41, %v2170_v20 }
 0x1c2   : > { %v3110_v39 = vmax.f32 %v3078_v1, 0.0  ;;  %v3077_v42 = vadd.f32 3.0, %v3045_v54  ;;  %v3048_v63 = vadd.f32 %v5959_v26, %v3009_v7  ;;  %v3008_v55 = vmul.f32 %v5946_v56, %v2969_v46  ;;  %v4353_v6 = vpop.f32.mrf.mxu0 }
 0x1c3   : > { %v2972_v16 = vadd.f32 %v4350_v35, %v2701_v48  ;;  %v2700_v52 = vadd.f32 %v2557_v0, %v2428_v4  ;;  %v4303_v38 = vpop.f32.mrf.mxu1 }
 0x1c4   : > { %v3142_v3 = vmin.f32 %v3110_v39, 6.0  ;;  %v3109_v61 = vmax.f32 %v3077_v42, 0.0  ;;  %v3080_v47 = vadd.f32 3.0, %v3048_v63  ;;  %v3047_v19 = vadd.f32 %v5959_v26, %v3008_v55  ;;  %v2838_v34 = vpop.f32.mrf.mxu0 }
 0x1c5   : > { %v3011_v8 = vmul.f32 %v5946_v56, %v2972_v16  ;;  %v2971_v23 = vadd.f32 %v2828_v60, %v2700_v52  ;;  %v2703_v59 = vadd.f32 %v4303_v38, %v2431_v30  ;;  %v2567_v31 = vpop.f32.mrf.mxu1 }
 0x1c6   : > { %v3174_v51 = vmul.f32 %v3142_v3, %v3046_v15  ;;  %v3141_v1 = vmin.f32 %v3109_v61, 6.0  ;;  %v3112_v35 = vmax.f32 %v3080_v47, 0.0  ;;  %v3079_v4 = vadd.f32 3.0, %v3047_v19  ;;  %v4356_v7 = vpop.f32.mrf.mxu0 }
 0x1c7   : > { %v3050_v46 = vadd.f32 %v5959_v26, %v3011_v8  ;;  %v3010_v29 = vmul.f32 %v5946_v56, %v2971_v23  ;;  %v2974_v28 = vadd.f32 %v4353_v6, %v2703_v59  ;;  %v2702_v24 = vadd.f32 %v2567_v31, %v2430_v43  ;;  %v4306_v60 = vpop.f32.mrf.mxu1 }
 0x1c8   : > { %v3206_v30 = vmul.f32 0.16666667, %v3174_v51  ;;  %v3173_v62 = vmul.f32 %v3141_v1, %v3045_v54  ;;  %v3144_v15 = vmin.f32 %v3112_v35, 6.0  ;;  %v3111_v20 = vmax.f32 %v3079_v4, 0.0  ;;  %v2848_v48 = vpop.f32.mrf.mxu0 }
 0x1c9   : > { %v3082_v0 = vadd.f32 3.0, %v3050_v46  ;;  %v3049_v39 = vadd.f32 %v5959_v26, %v3010_v29  ;;  %v3013_v42 = vmul.f32 %v5946_v56, %v2974_v28  ;;  %v2973_v55 = vadd.f32 %v2838_v34, %v2702_v24  ;;  %v2577_v40 = vpop.f32.mrf.mxu1 }
 0x1ca   : > { %3239 = vst.msk [vmem:[%s6010_s21 + $0x8] sm:$0xff] %vm3237_vm4, %v3206_v30  ;;  %v3205_v27 = vmul.f32 0.16666667, %v3173_v62  ;;  %v3176_v16 = vmul.f32 %v3144_v15, %v3048_v63  ;;  %v3143_v6 = vmin.f32 %v3111_v20, 6.0  ;;  %v2705_v43 = vadd.f32 %v4306_v60, %v5965_v32  ;;  %v4359_v52 = vpop.f32.mrf.mxu0 }
 0x1cb   : > { %v3114_v54 = vmax.f32 %v3082_v0, 0.0  ;;  %v3081_v38 = vadd.f32 3.0, %v3049_v39  ;;  %v3052_v3 = vadd.f32 %v5959_v26, %v3013_v42  ;;  %v3012_v61 = vmul.f32 %v5946_v56, %v2973_v55  ;;  %v4309_v47 = vpop.f32.mrf.mxu1 }
 0x1cc   : > { %3238 = vst.msk [vmem:[%s6010_s21] sm:$0xff] %vm3237_vm4, %v3205_v27  ;;  %v3208_v34 = vmul.f32 0.16666667, %v3176_v16  ;;  %v3175_v41 = vmul.f32 %v3143_v6, %v3047_v19  ;;  %v2976_v8 = vadd.f32 %v4356_v7, %v2705_v43  ;;  %v2704_v23 = vadd.f32 %v2577_v40, %v5974_v10  ;;  %v2858_v63 = vpop.f32.mrf.mxu0 }
 0x1cd   : > { %v3146_v59 = vmin.f32 %v3114_v54, 6.0  ;;  %v3113_v32 = vmax.f32 %v3081_v38, 0.0  ;;  %v3084_v31 = vadd.f32 3.0, %v3052_v3  ;;  %v3051_v51 = vadd.f32 %v5959_v26, %v3012_v61  ;;  %v2587_v1 = vpop.f32.mrf.mxu1 }
 0x1ce   : > { %3241 = vst.msk [vmem:[%s6010_s21 + $0x18] sm:$0xff] %vm3237_vm4, %v3208_v34  ;;  %v3207_v35 = vmul.f32 0.16666667, %v3175_v41  ;;  %v3015_v4 = vmul.f32 %v5946_v56, %v2976_v8  ;;  %v2975_v29 = vadd.f32 %v2848_v48, %v2704_v23  ;;  %v2707_v28 = vadd.f32 %v4309_v47, %v5977_v49  ;;  %v4362_v19 = vpop.f32.mrf.mxu0 }
 0x1cf   : > { %v3178_v7 = vmul.f32 %v3146_v59, %v3050_v46  ;;  %v3145_v24 = vmin.f32 %v3113_v32, 6.0  ;;  %v3116_v10 = vmax.f32 %v3084_v31, 0.0  ;;  %v3083_v60 = vadd.f32 3.0, %v3051_v51  ;;  %v4312_v30 = vpop.f32.mrf.mxu1 }
 0x1d0   : > { %3240 = vst.msk [vmem:[%s6010_s21 + $0x10] sm:$0xff] %vm3237_vm4, %v3207_v35  ;;  %v3054_v62 = vadd.f32 %v5959_v26, %v3015_v4  ;;  %v3014_v15 = vmul.f32 %v5946_v56, %v2975_v29  ;;  %v2978_v20 = vadd.f32 %v4359_v52, %v2707_v28  ;;  %v2706_v0 = vadd.f32 %v2587_v1, %v5986_v18  ;;  %v2868_v42 = vpop.f32.mrf.mxu0 }
 0x1d1   : > { %v3210_v48 = vmul.f32 0.16666667, %v3178_v7  ;;  %v3177_v55 = vmul.f32 %v3145_v24, %v3049_v39  ;;  %v3148_v49 = vmin.f32 %v3116_v10, 6.0  ;;  %v3115_v40 = vmax.f32 %v3083_v60, 0.0  ;;  %v2597_v46 = vpop.f32.mrf.mxu1 }
 0x1d2   : > { %v3086_v27 = vadd.f32 3.0, %v3054_v62  ;;  %v3053_v16 = vadd.f32 %v5959_v26, %v3014_v15  ;;  %v3017_v6 = vmul.f32 %v5946_v56, %v2978_v20  ;;  %v2977_v43 = vadd.f32 %v2858_v63, %v2706_v0  ;;  %v4365_v54 = vpop.f32.mrf.mxu0 }
 0x1d3   : > { %3243 = vst.msk [vmem:[%s6010_s21 + $0x28] sm:$0xff] %vm3237_vm4, %v3210_v48  ;;  %v3209_v38 = vmul.f32 0.16666667, %v3177_v55  ;;  %v3180_v52 = vmul.f32 %v3148_v49, %v3052_v3  ;;  %v3147_v61 = vmin.f32 %v3115_v40, 6.0  ;;  %v2709_v18 = vadd.f32 %v4312_v30, %v5989_v53  ;;  %v4315_v47 = vpop.f32.mrf.mxu1 }
 0x1d4   : > { %v3118_v39 = vmax.f32 %v3086_v27, 0.0  ;;  %v3085_v34 = vadd.f32 3.0, %v3053_v16  ;;  %v3056_v41 = vadd.f32 %v5959_v26, %v3017_v6  ;;  %v3016_v8 = vmul.f32 %v5946_v56, %v2977_v43  ;;  %v2878_v23 = vpop.f32.mrf.mxu0 }
 0x1d5   : > { %3242 = vst.msk [vmem:[%s6010_s21 + $0x20] sm:$0xff] %vm3237_vm4, %v3209_v38  ;;  %v3212_v63 = vmul.f32 0.16666667, %v3180_v52  ;;  %v3179_v59 = vmul.f32 %v3147_v61, %v3051_v51  ;;  %v2980_v32 = vadd.f32 %v4362_v19, %v2709_v18  ;;  %v2708_v31 = vadd.f32 %v2597_v46, %v5996_v33  ;;  %v2607_v3 = vpop.f32.mrf.mxu1 }
 0x1d6   : > { %v3150_v1 = vmin.f32 %v3118_v39, 6.0  ;;  %v3117_v53 = vmax.f32 %v3085_v34, 0.0  ;;  %v3088_v35 = vadd.f32 3.0, %v3056_v41  ;;  %v3055_v4 = vadd.f32 %v5959_v26, %v3016_v8  ;;  %v4368_v29 = vpop.f32.mrf.mxu0 }
 0x1d7   : > { %3245 = vst.msk [vmem:[%s6010_s21 + $0x38] sm:$0xff] %vm3237_vm4, %v3212_v63  ;;  %v3211_v28 = vmul.f32 0.16666667, %v3179_v59  ;;  %v3019_v7 = vmul.f32 %v5946_v56, %v2980_v32  ;;  %v2979_v24 = vadd.f32 %v2868_v42, %v2708_v31  ;;  %v2711_v10 = vadd.f32 %v4315_v47, %v5999_v13  ;;  %v4318_v51 = vpop.f32.mrf.mxu1 }
 0x1d8   : > { %v3182_v19 = vmul.f32 %v3150_v1, %v3054_v62  ;;  %v3149_v60 = vmin.f32 %v3117_v53, 6.0  ;;  %v3120_v33 = vmax.f32 %v3088_v35, 0.0  ;;  %v3087_v30 = vadd.f32 3.0, %v3055_v4  ;;  %v2888_v15 = vpop.f32.mrf.mxu0 }
 0x1d9   : > { %3244 = vst.msk [vmem:[%s6010_s21 + $0x30] sm:$0xff] %vm3237_vm4, %v3211_v28  ;;  %v3058_v20 = vadd.f32 %v5959_v26, %v3019_v7  ;;  %v3018_v0 = vmul.f32 %v5946_v56, %v2979_v24  ;;  %v2982_v48 = vadd.f32 %v4365_v54, %v2711_v10  ;;  %v2710_v55 = vadd.f32 %v2607_v3, %v6004_v37  ;;  %v2617_v49 = vpop.f32.mrf.mxu1 }
 0x1da   : > { %v3214_v42 = vmul.f32 0.16666667, %v3182_v19  ;;  %v3181_v40 = vmul.f32 %v3149_v60, %v3053_v16  ;;  %v3152_v13 = vmin.f32 %v3120_v33, 6.0  ;;  %v3119_v46 = vmax.f32 %v3087_v30, 0.0  ;;  %v4371_v62 = vpop.f32.mrf.mxu0 }
 0x1db   : > { %v3090_v27 = vadd.f32 3.0, %v3058_v20  ;;  %v3057_v6 = vadd.f32 %v5959_v26, %v3018_v0  ;;  %v3021_v43 = vmul.f32 %v5946_v56, %v2982_v48  ;;  %v2981_v38 = vadd.f32 %v2878_v23, %v2710_v55  ;;  %v4321_v52 = vpop.f32.mrf.mxu1 }
 0x1dc   : > { %3247 = vst.msk [vmem:[%s6010_s21 + $0x48] sm:$0xff] %vm3237_vm4, %v3214_v42  ;;  %v3213_v61 = vmul.f32 0.16666667, %v3181_v40  ;;  %v3184_v54 = vmul.f32 %v3152_v13, %v3056_v41  ;;  %v3151_v18 = vmin.f32 %v3119_v46, 6.0  ;;  %v2713_v37 = vadd.f32 %v4318_v51, %v5876_v9  ;;  %v2898_v47 = vpop.f32.mrf.mxu0 }
 0x1dd   : > { %v3122_v16 = vmax.f32 %v3090_v27, 0.0  ;;  %v3089_v39 = vadd.f32 3.0, %v3057_v6  ;;  %v3060_v34 = vadd.f32 %v5959_v26, %v3021_v43  ;;  %v3020_v8 = vmul.f32 %v5946_v56, %v2981_v38  ;;  %v2627_v63 = vpop.f32.mrf.mxu1 }
 0x1de   : > { %3246 = vst.msk [vmem:[%s6010_s21 + $0x40] sm:$0xff] %vm3237_vm4, %v3213_v61  ;;  %v3216_v23 = vmul.f32 0.16666667, %v3184_v54  ;;  %v3183_v59 = vmul.f32 %v3151_v18, %v3055_v4  ;;  %v2984_v32 = vadd.f32 %v4368_v29, %v2713_v37  ;;  %v2712_v31 = vadd.f32 %v2617_v49, %v5879_v17  ;;  %v4374_v41 = vpop.f32.mrf.mxu0 }
 0x1df   : > { %v3154_v3 = vmin.f32 %v3122_v16, 6.0  ;;  %v3121_v9 = vmax.f32 %v3089_v39, 0.0  ;;  %v3092_v1 = vadd.f32 3.0, %v3060_v34  ;;  %v3059_v53 = vadd.f32 %v5959_v26, %v3020_v8  ;;  %v4324_v35 = vpop.f32.mrf.mxu1 }
 0x1e0   : > { %3249 = vst.msk [vmem:[%s6010_s21 + $0x58] sm:$0xff] %vm3237_vm4, %v3216_v23  ;;  %v3215_v28 = vmul.f32 0.16666667, %v3183_v59  ;;  %v3023_v7 = vmul.f32 %v5946_v56, %v2984_v32  ;;  %v2983_v24 = vadd.f32 %v2888_v15, %v2712_v31  ;;  %v2715_v10 = vadd.f32 %v4321_v52, %v5882_v50  ;;  %v2908_v4 = vpop.f32.mrf.mxu0 }
 0x1e1   : > { %v3186_v29 = vmul.f32 %v3154_v3, %v3058_v20  ;;  %v3153_v51 = vmin.f32 %v3121_v9, 6.0  ;;  %v3124_v17 = vmax.f32 %v3092_v1, 0.0  ;;  %v3091_v19 = vadd.f32 3.0, %v3059_v53  ;;  %v2637_v60 = vpop.f32.mrf.mxu1 }
 0x1e2   : > { %3248 = vst.msk [vmem:[%s6010_s21 + $0x50] sm:$0xff] %vm3237_vm4, %v3215_v28  ;;  %v3062_v33 = vadd.f32 %v5959_v26, %v3023_v7  ;;  %v3022_v30 = vmul.f32 %v5946_v56, %v2983_v24  ;;  %v2986_v0 = vadd.f32 %v4371_v62, %v2715_v10  ;;  %v2714_v48 = vadd.f32 %v2627_v63, %v5885_v12  ;;  %v4377_v55 = vpop.f32.mrf.mxu0 }
 0x1e3   : > { %v3218_v15 = vmul.f32 0.16666667, %v3186_v29  ;;  %v3185_v49 = vmul.f32 %v3153_v51, %v3057_v6  ;;  %v3156_v50 = vmin.f32 %v3124_v17, 6.0  ;;  %v3123_v42 = vmax.f32 %v3091_v19, 0.0  ;;  %v4327_v20 = vpop.f32.mrf.mxu1 }
 0x1e4   : > { %v3094_v40 = vadd.f32 3.0, %v3062_v33  ;;  %v3061_v13 = vadd.f32 %v5959_v26, %v3022_v30  ;;  %v3025_v46 = vmul.f32 %v5946_v56, %v2986_v0  ;;  %v2985_v27 = vadd.f32 %v2898_v47, %v2714_v48  ;;  %v2918_v43 = vpop.f32.mrf.mxu0 }
 0x1e5   : > { %3251 = vst.msk [vmem:[%s6010_s21 + $0x68] sm:$0xff] %vm3237_vm4, %v3218_v15  ;;  %v3217_v38 = vmul.f32 0.16666667, %v3185_v49  ;;  %v3188_v62 = vmul.f32 %v3156_v50, %v3060_v34  ;;  %v3155_v52 = vmin.f32 %v3123_v42, 6.0  ;;  %v2717_v12 = vadd.f32 %v4324_v35, %v5888_v36  ;;  %v2647_v61 = vpop.f32.mrf.mxu1 }
 0x1e6   : > { %v3126_v6 = vmax.f32 %v3094_v40, 0.0  ;;  %v3093_v54 = vadd.f32 3.0, %v3061_v13  ;;  %v3064_v18 = vadd.f32 %v5959_v26, %v3025_v46  ;;  %v3024_v37 = vmul.f32 %v5946_v56, %v2985_v27  ;;  %v4380_v16 = vpop.f32.mrf.mxu0 }
 0x1e7   : > { %3250 = vst.msk [vmem:[%s6010_s21 + $0x60] sm:$0xff] %vm3237_vm4, %v3217_v38  ;;  %v3220_v47 = vmul.f32 0.16666667, %v3188_v62  ;;  %v3187_v39 = vmul.f32 %v3155_v52, %v3059_v53  ;;  %v2988_v8 = vadd.f32 %v4374_v41, %v2717_v12  ;;  %v2716_v63 = vadd.f32 %v2637_v60, %v5891_v22  ;;  %v4330_v34 = vpop.f32.mrf.mxu1 }
 0x1e8   : > { %v3158_v23 = vmin.f32 %v3126_v6, 6.0  ;;  %v3125_v36 = vmax.f32 %v3093_v54, 0.0  ;;  %v3096_v59 = vadd.f32 3.0, %v3064_v18  ;;  %v3063_v32 = vadd.f32 %v5959_v26, %v3024_v37  ;;  %v2928_v31 = vpop.f32.mrf.mxu0 }
 0x1e9   : > { %3253 = vst.msk [vmem:[%s6010_s21 + $0x78] sm:$0xff] %vm3237_vm4, %v3220_v47  ;;  %v3219_v3 = vmul.f32 0.16666667, %v3187_v39  ;;  %v3027_v9 = vmul.f32 %v5946_v56, %v2988_v8  ;;  %v2987_v1 = vadd.f32 %v2908_v4, %v2716_v63  ;;  %v2719_v35 = vadd.f32 %v4327_v20, %v5894_v58  ;;  %v2657_v53 = vpop.f32.mrf.mxu1 }
 0x1ea   : > { %v3190_v41 = vmul.f32 %v3158_v23, %v3062_v33  ;;  %v3157_v28 = vmin.f32 %v3125_v36, 6.0  ;;  %v3128_v22 = vmax.f32 %v3096_v59, 0.0  ;;  %v3095_v7 = vadd.f32 3.0, %v3063_v32  ;;  %v4383_v24 = vpop.f32.mrf.mxu0 }
 0x1eb   : > { %3252 = vst.msk [vmem:[%s6010_s21 + $0x70] sm:$0xff] %vm3237_vm4, %v3219_v3  ;;  %v3066_v10 = vadd.f32 %v5959_v26, %v3027_v9  ;;  %v3026_v29 = vmul.f32 %v5946_v56, %v2987_v1  ;;  %v2990_v51 = vadd.f32 %v4377_v55, %v2719_v35  ;;  %v2718_v17 = vadd.f32 %v2647_v61, %v5897_v25  ;;  %v4333_v19 = vpop.f32.mrf.mxu1 }
 0x1ec   : > { %v3222_v4 = vmul.f32 0.16666667, %v3190_v41  ;;  %v3189_v60 = vmul.f32 %v3157_v28, %v3061_v13  ;;  %v3160_v58 = vmin.f32 %v3128_v22, 6.0  ;;  %v3127_v30 = vmax.f32 %v3095_v7, 0.0  ;;  %v2938_v20 = vpop.f32.mrf.mxu0 }
 0x1ed   : > { %v3098_v33 = vadd.f32 3.0, %v3066_v10  ;;  %v3065_v0 = vadd.f32 %v5959_v26, %v3026_v29  ;;  %v3029_v48 = vmul.f32 %v5946_v56, %v2990_v51  ;;  %v2989_v15 = vadd.f32 %v2918_v43, %v2718_v17  ;;  %v2667_v49 = vpop.f32.mrf.mxu1 }
 0x1ee   : > { %3255 = vst.msk [vmem:[%s6010_s21 + $0x88] sm:$0xff] %vm3237_vm4, %v3222_v4  ;;  %v3221_v50 = vmul.f32 0.16666667, %v3189_v60  ;;  %v3192_v42 = vmul.f32 %v3160_v58, %v3064_v18  ;;  %v3159_v55 = vmin.f32 %v3127_v30, 6.0  ;;  %v2721_v25 = vadd.f32 %v4330_v34, %v5900_v11  ;;  %v4386_v8 = vpop.f32.mrf.mxu0 }
 0x1ef   : > { %v3130_v40 = vmax.f32 %v3098_v33, 0.0  ;;  %v3097_v13 = vadd.f32 3.0, %v3065_v0  ;;  %v3068_v46 = vadd.f32 %v5959_v26, %v3029_v48  ;;  %v3028_v27 = vmul.f32 %v5946_v56, %v2989_v15  ;;  %v4336_v38 = vpop.f32.mrf.mxu1 }
 0x1f0   : > { %3254 = vst.msk [vmem:[%s6010_s21 + $0x80] sm:$0xff] %vm3237_vm4, %v3221_v50  ;;  %v3224_v43 = vmul.f32 0.16666667, %v3192_v42  ;;  %v3191_v62 = vmul.f32 %v3159_v55, %v3063_v32  ;;  %v2992_v52 = vadd.f32 %v4380_v16, %v2721_v25  ;;  %v2720_v12 = vadd.f32 %v2657_v53, %v5903_v14  ;;  %v2948_v22 = vpop.f32.mrf.mxu0 }
 0x1f1   : > { %v3162_v61 = vmin.f32 %v3130_v40, 6.0  ;;  %v3129_v6 = vmax.f32 %v3097_v13, 0.0  ;;  %v3100_v11 = vadd.f32 3.0, %v3068_v46  ;;  %v3067_v54 = vadd.f32 %v5959_v26, %v3028_v27  ;;  %v2677_v63 = vpop.f32.mrf.mxu1 }
 0x1f2   : > { %3257 = vst.msk [vmem:[%s6010_s21 + $0x98] sm:$0xff] %vm3237_vm4, %v3224_v43  ;;  %v3223_v18 = vmul.f32 0.16666667, %v3191_v62  ;;  %v3031_v37 = vmul.f32 %v5946_v56, %v2992_v52  ;;  %v2991_v47 = vadd.f32 %v2928_v31, %v2720_v12  ;;  %v2723_v39 = vadd.f32 %v4333_v19, %v5906_v21 }
 0x1f3   : > { %v3194_v34 = vmul.f32 %v3162_v61, %v3066_v10  ;;  %v3161_v16 = vmin.f32 %v3129_v6, 6.0  ;;  %v3132_v23 = vmax.f32 %v3100_v11, 0.0  ;;  %v3099_v14 = vadd.f32 3.0, %v3067_v54  ;;  %v4339_v7 = vpop.f32.mrf.mxu1 }
 0x1f4   : > { %3256 = vst.msk [vmem:[%s6010_s21 + $0x90] sm:$0xff] %vm3237_vm4, %v3223_v18  ;;  %v3070_v36 = vadd.f32 %v5959_v26, %v3031_v37  ;;  %v3030_v59 = vmul.f32 %v5946_v56, %v2991_v47  ;;  %v2994_v32 = vadd.f32 %v4383_v24, %v2723_v39  ;;  %v2722_v3 = vadd.f32 %v2667_v49, %v5909_v2  ;;  %v4389_v49 = vpop.f32.mrf.mxu0 }
 0x1f5   : > { %v3226_v9 = vmul.f32 0.16666667, %v3194_v34  ;;  %v3193_v31 = vmul.f32 %v3161_v16, %v3065_v0  ;;  %v3164_v1 = vmin.f32 %v3132_v23, 6.0  ;;  %v3131_v21 = vmax.f32 %v3099_v14, 0.0  ;;  %v2687_v50 = vpop.f32.mrf.mxu1 }
 0x1f6   : > { %v3102_v35 = vadd.f32 3.0, %v3070_v36  ;;  %v3069_v53 = vadd.f32 %v5959_v26, %v3030_v59  ;;  %v3033_v41 = vmul.f32 %v5946_v56, %v2994_v32  ;;  %v2993_v28 = vadd.f32 %v2938_v20, %v2722_v3 }
 0x1f7   : > { %3259 = vst.msk [vmem:[%s6010_s21 + $0xa8] sm:$0xff] %vm3237_vm4, %v3226_v9  ;;  %v3225_v10 = vmul.f32 0.16666667, %v3193_v31  ;;  %v3196_v29 = vmul.f32 %v3164_v1, %v3068_v46  ;;  %v3163_v24 = vmin.f32 %v3131_v21, 6.0  ;;  %v2725_v2 = vadd.f32 %v4336_v38, %v5914_v5 }
 0x1f8   : > { %v3134_v51 = vmax.f32 %v3102_v35, 0.0  ;;  %v3101_v17 = vadd.f32 3.0, %v3069_v53  ;;  %v3072_v19 = vadd.f32 %v5959_v26, %v3033_v41  ;;  %v3032_v4 = vmul.f32 %v5946_v56, %v2993_v28 }
 0x1f9   : > { %3258 = vst.msk [vmem:[%s6010_s21 + $0xa0] sm:$0xff] %vm3237_vm4, %v3225_v10  ;;  %v3228_v60 = vmul.f32 0.16666667, %v3196_v29  ;;  %v3195_v58 = vmul.f32 %v3163_v24, %v3067_v54  ;;  %v2996_v30 = vadd.f32 %v4386_v8, %v2725_v2  ;;  %v2724_v33 = vadd.f32 %v2677_v63, %v5919_v44 }
 0x1fa   : > { %v3166_v0 = vmin.f32 %v3134_v51, 6.0  ;;  %v3133_v48 = vmax.f32 %v3101_v17, 0.0  ;;  %v3104_v15 = vadd.f32 3.0, %v3072_v19  ;;  %v3071_v5 = vadd.f32 %v5959_v26, %v3032_v4 }
 0x1fb   : > { %3261 = vst.msk [vmem:[%s6010_s21 + $0xb8] sm:$0xff] %vm3237_vm4, %v3228_v60  ;;  %v3227_v42 = vmul.f32 0.16666667, %v3195_v58  ;;  %v3035_v55 = vmul.f32 %v5946_v56, %v2996_v30  ;;  %v2995_v25 = vadd.f32 %v2948_v22, %v2724_v33  ;;  %v2727_v20 = vadd.f32 %v4339_v7, %v5927_v45  ;;  %v2958_v45 = vpop.f32.mrf.mxu0 }
 0x1fc   : > { %v3198_v40 = vmul.f32 %v3166_v0, %v3070_v36  ;;  %v3165_v13 = vmin.f32 %v3133_v48, 6.0  ;;  %v3136_v46 = vmax.f32 %v3104_v15, 0.0  ;;  %v3103_v44 = vadd.f32 3.0, %v3071_v5 }
 0x1fd   : > { %3260 = vst.msk [vmem:[%s6010_s21 + $0xb0] sm:$0xff] %vm3237_vm4, %v3227_v42  ;;  %v3074_v27 = vadd.f32 %v5959_v26, %v3035_v55  ;;  %v3034_v38 = vmul.f32 %v5946_v56, %v2995_v25  ;;  %v2998_v43 = vadd.f32 %v4389_v49, %v2727_v20  ;;  %v2726_v62 = vadd.f32 %v2687_v50, %v5937_v57 }
 0x1fe   : > { %v3230_v52 = vmul.f32 0.16666667, %v3198_v40  ;;  %v3197_v12 = vmul.f32 %v3165_v13, %v3069_v53  ;;  %v3168_v61 = vmin.f32 %v3136_v46, 6.0  ;;  %v3135_v6 = vmax.f32 %v3103_v44, 0.0 }
 0x1ff   : > { %v3106_v11 = vadd.f32 3.0, %v3074_v27  ;;  %v3073_v54 = vadd.f32 %v5959_v26, %v3034_v38  ;;  %v3037_v18 = vmul.f32 %v5946_v56, %v2998_v43  ;;  %v2997_v37 = vadd.f32 %v2958_v45, %v2726_v62 }
 0x200   : > { %3263 = vst.msk [vmem:[%s6010_s21 + $0xc8] sm:$0xff] %vm3237_vm4, %v3230_v52  ;;  %v3229_v47 = vmul.f32 0.16666667, %v3197_v12  ;;  %v3200_v39 = vmul.f32 %v3168_v61, %v3072_v19  ;;  %v3167_v8 = vmin.f32 %v3135_v6, 6.0 }
 0x201   : > { %v3138_v63 = vmax.f32 %v3106_v11, 0.0  ;;  %v3105_v57 = vadd.f32 3.0, %v3073_v54  ;;  %v3076_v34 = vadd.f32 %v5959_v26, %v3037_v18  ;;  %v3036_v16 = vmul.f32 %v5946_v56, %v2997_v37 }
 0x202   : > { %3262 = vst.msk [vmem:[%s6010_s21 + $0xc0] sm:$0xff] %vm3237_vm4, %v3229_v47  ;;  %v3232_v23 = vmul.f32 0.16666667, %v3200_v39  ;;  %v3199_v14 = vmul.f32 %v3167_v8, %v3071_v5 }
 0x203   : > { %v3170_v36 = vmin.f32 %v3138_v63, 6.0  ;;  %v3137_v59 = vmax.f32 %v3105_v57, 0.0  ;;  %v3108_v32 = vadd.f32 3.0, %v3076_v34  ;;  %v3075_v3 = vadd.f32 %v5959_v26, %v3036_v16 }
 0x204   : > { %3265 = vst.msk [vmem:[%s6010_s21 + $0xd8] sm:$0xff] %vm3237_vm4, %v3232_v23  ;;  %v3231_v9 = vmul.f32 0.16666667, %v3199_v14 }
 0x205   : > { %v3202_v31 = vmul.f32 %v3170_v36, %v3074_v27  ;;  %v3169_v1 = vmin.f32 %v3137_v59, 6.0  ;;  %v3140_v21 = vmax.f32 %v3108_v32, 0.0  ;;  %v3107_v56 = vadd.f32 3.0, %v3075_v3 }
 0x206   : > { %3264 = vst.msk [vmem:[%s6010_s21 + $0xd0] sm:$0xff] %vm3237_vm4, %v3231_v9 }
 0x207   : > { %v3234_v35 = vmul.f32 0.16666667, %v3202_v31  ;;  %v3201_v53 = vmul.f32 %v3169_v1, %v3073_v54  ;;  %v3172_v41 = vmin.f32 %v3140_v21, 6.0  ;;  %v3139_v28 = vmax.f32 %v3107_v56, 0.0 }
 0x209   : > { %3267 = vst.msk [vmem:[%s6010_s21 + $0xe8] sm:$0xff] %vm3237_vm4, %v3234_v35  ;;  %v3233_v22 = vmul.f32 0.16666667, %v3201_v53  ;;  %v3204_v26 = vmul.f32 %v3172_v41, %v3076_v34  ;;  %v3171_v7 = vmin.f32 %v3139_v28, 6.0 }
 0x20b   : > { %3266 = vst.msk [vmem:[%s6010_s21 + $0xe0] sm:$0xff] %vm3237_vm4, %v3233_v22  ;;  %v3236_v10 = vmul.f32 0.16666667, %v3204_v26  ;;  %v3203_v29 = vmul.f32 %v3171_v7, %v3075_v3 }
 0x20d   : > { %3269 = vst.msk [vmem:[%s6010_s21 + $0xf8] sm:$0xff] %vm3237_vm4, %v3236_v10  ;;  %v3235_v24 = vmul.f32 0.16666667, %v3203_v29 }
 0x20f   : > { %3268 = vst.msk [vmem:[%s6010_s21 + $0xf0] sm:$0xff] %vm3237_vm4, %v3235_v24 }
 0x210 PF: > { %s14_s15 = sadd.s32 1, %s4407_s15  }
 0x211   : > { %p11_p4 = scmp.ge.s32.totalorder %s14_s15, 4  }
 0x213   :  { %13 = sbr.rel (!%p11_p4) target bundleno = 1 (0x1), region = 74 }

</bundles_post_ra>
